<compile_context>
chip_gen: v7x
topology: tpu7x:2x2x1
jax: 0.10.0
libtpu: 0.0.40
codegen_flags: <defaults>
</compile_context>

<pallas_src>
import functools

import jax
import jax.numpy as jnp
from jax.experimental import pallas as pl
from jax.experimental.pallas import tpu as pltpu

# ---------------- model config (small, synthetic) ----------------
VOCAB = 100
MAX_POS = 16
HIDDEN = 32
N_HEADS = 4
D_HEAD = HIDDEN // N_HEADS
FFN = 64
N_LAYERS = 2
LN_EPS = 1e-12  # DistilBERT LayerNorm eps


# ---------------- fused Pallas kernel (one sequence per grid step) ----------------
def _distilbert_kernel(emb_ref, mask_ref,
                       elng_ref, elnb_ref,
                       qkvw_ref, qkvb_ref,
                       attw_ref, attb_ref,
                       ln1g_ref, ln1b_ref,
                       f1w_ref, f1b_ref,
                       f2w_ref, f2b_ref,
                       ln2g_ref, ln2b_ref,
                       out_ref, *, n_layers, n_heads, d_head, hidden):
    scale = 1.0 / (d_head ** 0.5)

    def layernorm(z, g, b):
        mu = jnp.mean(z, axis=-1, keepdims=True)
        var = jnp.mean((z - mu) * (z - mu), axis=-1, keepdims=True)
        return (z - mu) * jax.lax.rsqrt(var + LN_EPS) * g + b

    def gelu(z):  # exact erf-GELU, matching HuggingFace DistilBERT "gelu"
        return 0.5 * z * (1.0 + jax.lax.erf(z * 0.7071067811865476))

    mask_bias = mask_ref[0]                                      # (1, S) additive key mask
    x = layernorm(emb_ref[0], elng_ref[...], elnb_ref[...])      # (S, H)

    def attention(q_rows, qkv):
        # q_rows: (nq, 3H) rows supplying queries; qkv: (S, 3H) supplies K/V.
        heads = []
        for h in range(n_heads):
            lo = h * d_head
            q = q_rows[:, lo:lo + d_head]                                     # (nq, dH)
            k = qkv[:, hidden + lo:hidden + lo + d_head]                      # (S, dH)
            v = qkv[:, 2 * hidden + lo:2 * hidden + lo + d_head]              # (S, dH)
            s = jnp.einsum("qd,kd->qk", q * scale, k,
                           preferred_element_type=jnp.float32) + mask_bias    # (nq, S)
            m = jnp.max(s, axis=-1, keepdims=True)
            p = jnp.exp(s - m)
            # exp(s - max) guarantees sum >= 1, so the approximate reciprocal is
            # safe even for fully-masked rows (no divide-by-zero / NaN).
            p = p * pl.reciprocal(jnp.sum(p, axis=-1, keepdims=True), approx=True)
            heads.append(jnp.dot(p, v, preferred_element_type=jnp.float32))   # (nq, dH)
        return jnp.concatenate(heads, axis=-1)                                # (nq, H)

    def transformer_layer(x, l, cls_only):
        # fused QKV projection: one (S,H)@(H,3H) MXU pass instead of three N=32 passes
        qkv = jnp.dot(x, qkvw_ref[l],
                      preferred_element_type=jnp.float32) + qkvb_ref[l]       # (S, 3H)
        if cls_only:
            q_rows = qkv[0:1, :]   # only the CLS query feeds the returned output
            resid = x[0:1, :]
        else:
            q_rows = qkv
            resid = x
        ctx = attention(q_rows, qkv)                                          # (nq, H)
        att = jnp.dot(ctx, attw_ref[l],
                      preferred_element_type=jnp.float32) + attb_ref[l]
        y = layernorm(att + resid, ln1g_ref[l], ln1b_ref[l])
        f = gelu(jnp.dot(y, f1w_ref[l],
                         preferred_element_type=jnp.float32) + f1b_ref[l])
        f = jnp.dot(f, f2w_ref[l],
                    preferred_element_type=jnp.float32) + f2b_ref[l]
        return layernorm(f + y, ln2g_ref[l], ln2b_ref[l])

    for l in range(n_layers - 1):
        x = transformer_layer(x, l, cls_only=False)
    cls = transformer_layer(x, n_layers - 1, cls_only=True)                   # (1, H)
    out_ref[0] = cls.astype(out_ref.dtype)


# ---------------- parameter init (deterministic, same as original) ----------------
def init_params(key):
    def dense(key, fan_in, fan_out):
        kw, kb = jax.random.split(key)
        w = jax.random.normal(kw, (fan_in, fan_out), jnp.float32) * 0.02
        b = jax.random.normal(kb, (1, fan_out), jnp.float32) * 0.02
        return w, b

    keys = jax.random.split(key, 3 + N_LAYERS)
    params = {
        "word_emb": jax.random.normal(keys[0], (VOCAB, HIDDEN), jnp.float32) * 0.02,
        "pos_emb": jax.random.normal(keys[1], (MAX_POS, HIDDEN), jnp.float32) * 0.02,
        "emb_ln_g": jnp.ones((1, HIDDEN), jnp.float32),
        "emb_ln_b": jnp.zeros((1, HIDDEN), jnp.float32),
        "layers": [],
    }
    for li in range(N_LAYERS):
        lk = jax.random.split(keys[3 + li], 6)
        qw, qb = dense(lk[0], HIDDEN, HIDDEN)
        kw, kb = dense(lk[1], HIDDEN, HIDDEN)
        vw, vb = dense(lk[2], HIDDEN, HIDDEN)
        ow, ob = dense(lk[3], HIDDEN, HIDDEN)
        f1w, f1b = dense(lk[4], HIDDEN, FFN)
        f2w, f2b = dense(lk[5], FFN, HIDDEN)
        params["layers"].append({
            "q_w": qw, "q_b": qb, "k_w": kw, "k_b": kb, "v_w": vw, "v_b": vb,
            "o_w": ow, "o_b": ob,
            "sa_ln_g": jnp.ones((1, HIDDEN), jnp.float32),
            "sa_ln_b": jnp.zeros((1, HIDDEN), jnp.float32),
            "ff1_w": f1w, "ff1_b": f1b, "ff2_w": f2w, "ff2_b": f2b,
            "out_ln_g": jnp.ones((1, HIDDEN), jnp.float32),
            "out_ln_b": jnp.zeros((1, HIDDEN), jnp.float32),
        })
    return params


def _pack_params(params):
    """Stack per-layer weights and fuse Q/K/V into one (H, 3H) projection."""
    layers = params["layers"]
    stack = lambda name: jnp.stack([l[name] for l in layers], axis=0)
    qkv_w = jnp.stack(
        [jnp.concatenate([l["q_w"], l["k_w"], l["v_w"]], axis=1) for l in layers], axis=0)
    qkv_b = jnp.stack(
        [jnp.concatenate([l["q_b"], l["k_b"], l["v_b"]], axis=1) for l in layers], axis=0)
    return [
        params["emb_ln_g"], params["emb_ln_b"],
        qkv_w, qkv_b,
        stack("o_w"), stack("o_b"),
        stack("sa_ln_g"), stack("sa_ln_b"),
        stack("ff1_w"), stack("ff1_b"),
        stack("ff2_w"), stack("ff2_b"),
        stack("out_ln_g"), stack("out_ln_b"),
    ]


# ---------------- forward pass (= DistilBERTFeatureExtractor.forward) ----------------
def distilbert_cls(params, input_ids, attention_mask):
    B, S = input_ids.shape

    # Embedding gathers are plain-JAX glue (no clean Pallas gather at this size).
    word = jnp.take(params["word_emb"], input_ids, axis=0)           # (B, S, H)
    pos = params["pos_emb"][:S][None, :, :]                          # (1, S, H)
    emb = (word + pos).astype(jnp.float32)                           # (B, S, H)
    # TODO(synk): dropout is a no-op in eval mode and is omitted.

    # additive attention-mask bias over keys (kept in f32 end-to-end)
    mask_bias = jnp.where(attention_mask == 0,
                          jnp.float32(-1e30), jnp.float32(0.0))[:, None, :]  # (B, 1, S)

    weights = _pack_params(params)

    kernel = functools.partial(
        _distilbert_kernel,
        n_layers=N_LAYERS, n_heads=N_HEADS, d_head=D_HEAD, hidden=HIDDEN)

    def full_spec(a):  # whole-array block, same block every grid step (no re-copy)
        return pl.BlockSpec(a.shape, lambda b, _nd=a.ndim: (0,) * _nd)

    out = pl.pallas_call(
        kernel,
        out_shape=jax.ShapeDtypeStruct((B, 1, HIDDEN), jnp.float32),
        grid=(B,),
        in_specs=[
            pl.BlockSpec((1, S, HIDDEN), lambda b: (b, 0, 0)),   # per-sequence tokens
            pl.BlockSpec((1, 1, S), lambda b: (b, 0, 0)),        # per-sequence mask bias
        ] + [full_spec(w) for w in weights],
        out_specs=pl.BlockSpec((1, 1, HIDDEN), lambda b: (b, 0, 0)),
        compiler_params=pltpu.CompilerParams(
            dimension_semantics=("parallel",)),   # batch shards across 2 TCs on v7x
    )(emb, mask_bias, *weights)

    return out[:, 0, :]                                              # (B, H) CLS features


# ---------------- pure-JAX reference (for a correctness self-check) ----------------
def distilbert_cls_reference(params, input_ids, attention_mask):
    B, S = input_ids.shape

    def ln(z, g, b):
        mu = z.mean(-1, keepdims=True)
        var = ((z - mu) ** 2).mean(-1, keepdims=True)
        return (z - mu) / jnp.sqrt(var + LN_EPS) * g + b

    word = jnp.take(params["word_emb"], input_ids, axis=0)
    pos = params["pos_emb"][:S][None, :, :]
    h = ln(word + pos, params["emb_ln_g"], params["emb_ln_b"])       # (B, S, H)
    bias = jnp.where(attention_mask == 0, -1e30, 0.0).astype(jnp.float32)[:, None, None, :]

    for layer in params["layers"]:
        x = h
        q = x @ layer["q_w"] + layer["q_b"]
        k = x @ layer["k_w"] + layer["k_b"]
        v = x @ layer["v_w"] + layer["v_b"]
        split = lambda t: t.reshape(B, S, N_HEADS, D_HEAD).transpose(0, 2, 1, 3)
        q, k, v = split(q), split(k), split(v)
        s = jnp.einsum("bhqd,bhkd->bhqk", q, k) / (D_HEAD ** 0.5) + bias
        p = jax.nn.softmax(s, axis=-1)
        ctx = jnp.einsum("bhqk,bhkd->bhqd", p, v).transpose(0, 2, 1, 3).reshape(B, S, HIDDEN)
        h = ln(ctx @ layer["o_w"] + layer["o_b"] + x, layer["sa_ln_g"], layer["sa_ln_b"])
        f = h @ layer["ff1_w"] + layer["ff1_b"]
        f = 0.5 * f * (1.0 + jax.lax.erf(f * 0.7071067811865476))
        f = f @ layer["ff2_w"] + layer["ff2_b"]
        h = ln(f + h, layer["out_ln_g"], layer["out_ln_b"])
    return h[:, 0]


if __name__ == "__main__":
    B, S = 2, 8
    key = jax.random.PRNGKey(0)
    k_param, k_ids = jax.random.split(key)

    params = init_params(k_param)
    input_ids = jax.random.randint(k_ids, (B, S), 0, VOCAB, dtype=jnp.int32)
    # last two tokens of the second sequence padded out
    attention_mask = jnp.array(
        [[1, 1, 1, 1, 1, 1, 1, 1],
         [1, 1, 1, 1, 1, 1, 0, 0]], dtype=jnp.int32)

    cls_features = jax.jit(distilbert_cls)(params, input_ids, attention_mask)
    cls_features = jax.block_until_ready(cls_features)
    assert cls_features.shape == (B, HIDDEN)
    assert bool(jnp.all(jnp.isfinite(cls_features)))

    # self-check against pure JAX (loose tol: approx reciprocal in softmax)
    ref = distilbert_cls_reference(params, input_ids, attention_mask)
    assert bool(jnp.allclose(cls_features, ref, rtol=5e-2, atol=5e-3)), (
        "max abs diff vs reference: %f" % float(jnp.max(jnp.abs(cls_features - ref))))

    print("KERNEL_OK")
</pallas_src>

<mosaic_0001>
module attributes {stable_mosaic.version = 11 : i64} {
  func.func @_distilbert_kernel(%arg0: i32, %arg1: memref<1x8x32xf32, #tpu.memory_space<vmem>>, %arg2: memref<1x1x8xf32, #tpu.memory_space<vmem>>, %arg3: memref<1x32xf32, #tpu.memory_space<vmem>>, %arg4: memref<1x32xf32, #tpu.memory_space<vmem>>, %arg5: memref<2x32x96xf32, #tpu.memory_space<vmem>>, %arg6: memref<2x1x96xf32, #tpu.memory_space<vmem>>, %arg7: memref<2x32x32xf32, #tpu.memory_space<vmem>>, %arg8: memref<2x1x32xf32, #tpu.memory_space<vmem>>, %arg9: memref<2x1x32xf32, #tpu.memory_space<vmem>>, %arg10: memref<2x1x32xf32, #tpu.memory_space<vmem>>, %arg11: memref<2x32x64xf32, #tpu.memory_space<vmem>>, %arg12: memref<2x1x64xf32, #tpu.memory_space<vmem>>, %arg13: memref<2x64x32xf32, #tpu.memory_space<vmem>>, %arg14: memref<2x1x32xf32, #tpu.memory_space<vmem>>, %arg15: memref<2x1x32xf32, #tpu.memory_space<vmem>>, %arg16: memref<2x1x32xf32, #tpu.memory_space<vmem>>, %arg17: memref<1x1x32xf32, #tpu.memory_space<vmem>>) attributes {dimension_semantics = [#tpu.dimension_semantics<parallel>], iteration_bounds = array<i64: 2>, scalar_prefetch = 0 : i64, scratch_operands = 0 : i64, tpu.core_type = #tpu.core_type<tc>, window_params = [{transform_indices = @transform_0, window_bounds = array<i64: 1, 8, 32>}, {transform_indices = @transform_1, window_bounds = array<i64: 1, 1, 8>}, {pipeline_mode = #tpu.pipeline_mode<synchronous>, transform_indices = @transform_2, window_bounds = array<i64: 1, 32>}, {pipeline_mode = #tpu.pipeline_mode<synchronous>, transform_indices = @transform_3, window_bounds = array<i64: 1, 32>}, {pipeline_mode = #tpu.pipeline_mode<synchronous>, transform_indices = @transform_4, window_bounds = array<i64: 2, 32, 96>}, {pipeline_mode = #tpu.pipeline_mode<synchronous>, transform_indices = @transform_5, window_bounds = array<i64: 2, 1, 96>}, {pipeline_mode = #tpu.pipeline_mode<synchronous>, transform_indices = @transform_6, window_bounds = array<i64: 2, 32, 32>}, {pipeline_mode = #tpu.pipeline_mode<synchronous>, transform_indices = @transform_7, window_bounds = array<i64: 2, 1, 32>}, {pipeline_mode = #tpu.pipeline_mode<synchronous>, transform_indices = @transform_8, window_bounds = array<i64: 2, 1, 32>}, {pipeline_mode = #tpu.pipeline_mode<synchronous>, transform_indices = @transform_9, window_bounds = array<i64: 2, 1, 32>}, {pipeline_mode = #tpu.pipeline_mode<synchronous>, transform_indices = @transform_10, window_bounds = array<i64: 2, 32, 64>}, {pipeline_mode = #tpu.pipeline_mode<synchronous>, transform_indices = @transform_11, window_bounds = array<i64: 2, 1, 64>}, {pipeline_mode = #tpu.pipeline_mode<synchronous>, transform_indices = @transform_12, window_bounds = array<i64: 2, 64, 32>}, {pipeline_mode = #tpu.pipeline_mode<synchronous>, transform_indices = @transform_13, window_bounds = array<i64: 2, 1, 32>}, {pipeline_mode = #tpu.pipeline_mode<synchronous>, transform_indices = @transform_14, window_bounds = array<i64: 2, 1, 32>}, {pipeline_mode = #tpu.pipeline_mode<synchronous>, transform_indices = @transform_15, window_bounds = array<i64: 2, 1, 32>}, {transform_indices = @transform_16, window_bounds = array<i64: 1, 1, 32>}]} {
    %c0 = arith.constant 0 : index
    %c0_0 = arith.constant 0 : index
    %c0_1 = arith.constant 0 : index
    %0 = vector.load %arg2[%c0, %c0_0, %c0_1] : memref<1x1x8xf32, #tpu.memory_space<vmem>>, vector<1x1x8xf32>
    %1 = vector.shape_cast %0 : vector<1x1x8xf32> to vector<1x8xf32>
    %c0_2 = arith.constant 0 : index
    %c0_3 = arith.constant 0 : index
    %c0_4 = arith.constant 0 : index
    %2 = vector.load %arg1[%c0_2, %c0_3, %c0_4] : memref<1x8x32xf32, #tpu.memory_space<vmem>>, vector<1x8x32xf32>
    %3 = vector.shape_cast %2 : vector<1x8x32xf32> to vector<8x32xf32>
    %c0_5 = arith.constant 0 : index
    %c0_6 = arith.constant 0 : index
    %4 = vector.load %arg3[%c0_5, %c0_6] : memref<1x32xf32, #tpu.memory_space<vmem>>, vector<1x32xf32>
    %c0_7 = arith.constant 0 : index
    %c0_8 = arith.constant 0 : index
    %5 = vector.load %arg4[%c0_7, %c0_8] : memref<1x32xf32, #tpu.memory_space<vmem>>, vector<1x32xf32>
    %cst = arith.constant dense<0.000000e+00> : vector<8xf32>
    %6 = vector.multi_reduction <add>, %3, %cst [1] : vector<8x32xf32> to vector<8xf32>
    %7 = vector.shape_cast %6 : vector<8xf32> to vector<8x1xf32>
    %cst_9 = arith.constant 3.200000e+01 : f32
    %8 = vector.broadcast %cst_9 : f32 to vector<8x1xf32>
    %9 = arith.divf %7, %8 : vector<8x1xf32>
    %10 = vector.broadcast %9 : vector<8x1xf32> to vector<8x32xf32>
    %11 = arith.subf %3, %10 : vector<8x32xf32>
    %12 = vector.broadcast %9 : vector<8x1xf32> to vector<8x32xf32>
    %13 = arith.subf %3, %12 : vector<8x32xf32>
    %14 = arith.mulf %11, %13 : vector<8x32xf32>
    %cst_10 = arith.constant dense<0.000000e+00> : vector<8xf32>
    %15 = vector.multi_reduction <add>, %14, %cst_10 [1] : vector<8x32xf32> to vector<8xf32>
    %16 = vector.shape_cast %15 : vector<8xf32> to vector<8x1xf32>
    %cst_11 = arith.constant 3.200000e+01 : f32
    %17 = vector.broadcast %cst_11 : f32 to vector<8x1xf32>
    %18 = arith.divf %16, %17 : vector<8x1xf32>
    %19 = vector.broadcast %9 : vector<8x1xf32> to vector<8x32xf32>
    %20 = arith.subf %3, %19 : vector<8x32xf32>
    %cst_12 = arith.constant 9.99999996E-13 : f32
    %21 = vector.broadcast %cst_12 : f32 to vector<8x1xf32>
    %22 = arith.addf %18, %21 : vector<8x1xf32>
    %23 = math.rsqrt %22 : vector<8x1xf32>
    %24 = vector.broadcast %23 : vector<8x1xf32> to vector<8x32xf32>
    %25 = arith.mulf %20, %24 : vector<8x32xf32>
    %26 = vector.broadcast %4 : vector<1x32xf32> to vector<8x32xf32>
    %27 = arith.mulf %25, %26 : vector<8x32xf32>
    %28 = vector.broadcast %5 : vector<1x32xf32> to vector<8x32xf32>
    %29 = arith.addf %27, %28 : vector<8x32xf32>
    %c0_13 = arith.constant 0 : index
    %c0_14 = arith.constant 0 : index
    %c0_15 = arith.constant 0 : index
    %30 = vector.load %arg5[%c0_13, %c0_14, %c0_15] : memref<2x32x96xf32, #tpu.memory_space<vmem>>, vector<1x32x96xf32>
    %31 = vector.shape_cast %30 : vector<1x32x96xf32> to vector<32x96xf32>
    %cst_16 = arith.constant dense<0.000000e+00> : vector<8x96xf32>
    %32 = tpu.matmul %29, %31, %cst_16 {dimension_numbers = #tpu.dot_dimension_numbers<[1], [0], [0], [1], [0, 0, 1, 1], [], []>} : vector<8x32xf32>, vector<32x96xf32>, vector<8x96xf32> -> vector<8x96xf32>
    %c0_17 = arith.constant 0 : index
    %c0_18 = arith.constant 0 : index
    %c0_19 = arith.constant 0 : index
    %33 = vector.load %arg6[%c0_17, %c0_18, %c0_19] : memref<2x1x96xf32, #tpu.memory_space<vmem>>, vector<1x1x96xf32>
    %34 = vector.shape_cast %33 : vector<1x1x96xf32> to vector<1x96xf32>
    %35 = vector.broadcast %34 : vector<1x96xf32> to vector<8x96xf32>
    %36 = arith.addf %32, %35 : vector<8x96xf32>
    %37 = vector.extract_strided_slice %36 {offsets = [0, 0], sizes = [8, 8], strides = [1, 1]} : vector<8x96xf32> to vector<8x8xf32>
    %38 = vector.extract_strided_slice %36 {offsets = [0, 32], sizes = [8, 8], strides = [1, 1]} : vector<8x96xf32> to vector<8x8xf32>
    %39 = vector.extract_strided_slice %36 {offsets = [0, 64], sizes = [8, 8], strides = [1, 1]} : vector<8x96xf32> to vector<8x8xf32>
    %cst_20 = arith.constant 0.353553385 : f32
    %40 = vector.broadcast %cst_20 : f32 to vector<8x8xf32>
    %41 = arith.mulf %37, %40 : vector<8x8xf32>
    "tpu.trace_start"() <{level = 10 : i32, message = "qd,kd->qk"}> : () -> ()
    %cst_21 = arith.constant dense<0.000000e+00> : vector<8x8xf32>
    %42 = tpu.matmul %41, %38, %cst_21 {dimension_numbers = #tpu.dot_dimension_numbers<[1], [1], [0], [0], [0, 0, 1, 0], [], []>} : vector<8x8xf32>, vector<8x8xf32>, vector<8x8xf32> -> vector<8x8xf32>
    "tpu.trace_stop"() : () -> ()
    %43 = vector.broadcast %1 : vector<1x8xf32> to vector<8x8xf32>
    %44 = arith.addf %42, %43 : vector<8x8xf32>
    %cst_22 = arith.constant dense<0xFF800000> : vector<8xf32>
    %45 = vector.multi_reduction <maximumf>, %44, %cst_22 [1] : vector<8x8xf32> to vector<8xf32>
    %46 = vector.shape_cast %45 : vector<8xf32> to vector<8x1xf32>
    %47 = vector.broadcast %46 : vector<8x1xf32> to vector<8x8xf32>
    %48 = arith.subf %44, %47 : vector<8x8xf32>
    %49 = math.exp %48 : vector<8x8xf32>
    %cst_23 = arith.constant dense<0.000000e+00> : vector<8xf32>
    %50 = vector.multi_reduction <add>, %49, %cst_23 [1] : vector<8x8xf32> to vector<8xf32>
    %51 = vector.shape_cast %50 : vector<8xf32> to vector<8x1xf32>
    %52 = tpu.reciprocal %51 {approx = true} : vector<8x1xf32> -> vector<8x1xf32>
    %53 = vector.broadcast %52 : vector<8x1xf32> to vector<8x8xf32>
    %54 = arith.mulf %49, %53 : vector<8x8xf32>
    %cst_24 = arith.constant dense<0.000000e+00> : vector<8x8xf32>
    %55 = tpu.matmul %54, %39, %cst_24 {dimension_numbers = #tpu.dot_dimension_numbers<[1], [0], [0], [1], [0, 0, 1, 1], [], []>} : vector<8x8xf32>, vector<8x8xf32>, vector<8x8xf32> -> vector<8x8xf32>
    %56 = vector.extract_strided_slice %36 {offsets = [0, 8], sizes = [8, 8], strides = [1, 1]} : vector<8x96xf32> to vector<8x8xf32>
    %57 = vector.extract_strided_slice %36 {offsets = [0, 40], sizes = [8, 8], strides = [1, 1]} : vector<8x96xf32> to vector<8x8xf32>
    %58 = vector.extract_strided_slice %36 {offsets = [0, 72], sizes = [8, 8], strides = [1, 1]} : vector<8x96xf32> to vector<8x8xf32>
    %cst_25 = arith.constant 0.353553385 : f32
    %59 = vector.broadcast %cst_25 : f32 to vector<8x8xf32>
    %60 = arith.mulf %56, %59 : vector<8x8xf32>
    "tpu.trace_start"() <{level = 10 : i32, message = "qd,kd->qk"}> : () -> ()
    %cst_26 = arith.constant dense<0.000000e+00> : vector<8x8xf32>
    %61 = tpu.matmul %60, %57, %cst_26 {dimension_numbers = #tpu.dot_dimension_numbers<[1], [1], [0], [0], [0, 0, 1, 0], [], []>} : vector<8x8xf32>, vector<8x8xf32>, vector<8x8xf32> -> vector<8x8xf32>
    "tpu.trace_stop"() : () -> ()
    %62 = vector.broadcast %1 : vector<1x8xf32> to vector<8x8xf32>
    %63 = arith.addf %61, %62 : vector<8x8xf32>
    %cst_27 = arith.constant dense<0xFF800000> : vector<8xf32>
    %64 = vector.multi_reduction <maximumf>, %63, %cst_27 [1] : vector<8x8xf32> to vector<8xf32>
    %65 = vector.shape_cast %64 : vector<8xf32> to vector<8x1xf32>
    %66 = vector.broadcast %65 : vector<8x1xf32> to vector<8x8xf32>
    %67 = arith.subf %63, %66 : vector<8x8xf32>
    %68 = math.exp %67 : vector<8x8xf32>
    %cst_28 = arith.constant dense<0.000000e+00> : vector<8xf32>
    %69 = vector.multi_reduction <add>, %68, %cst_28 [1] : vector<8x8xf32> to vector<8xf32>
    %70 = vector.shape_cast %69 : vector<8xf32> to vector<8x1xf32>
    %71 = tpu.reciprocal %70 {approx = true} : vector<8x1xf32> -> vector<8x1xf32>
    %72 = vector.broadcast %71 : vector<8x1xf32> to vector<8x8xf32>
    %73 = arith.mulf %68, %72 : vector<8x8xf32>
    %cst_29 = arith.constant dense<0.000000e+00> : vector<8x8xf32>
    %74 = tpu.matmul %73, %58, %cst_29 {dimension_numbers = #tpu.dot_dimension_numbers<[1], [0], [0], [1], [0, 0, 1, 1], [], []>} : vector<8x8xf32>, vector<8x8xf32>, vector<8x8xf32> -> vector<8x8xf32>
    %75 = vector.extract_strided_slice %36 {offsets = [0, 16], sizes = [8, 8], strides = [1, 1]} : vector<8x96xf32> to vector<8x8xf32>
    %76 = vector.extract_strided_slice %36 {offsets = [0, 48], sizes = [8, 8], strides = [1, 1]} : vector<8x96xf32> to vector<8x8xf32>
    %77 = vector.extract_strided_slice %36 {offsets = [0, 80], sizes = [8, 8], strides = [1, 1]} : vector<8x96xf32> to vector<8x8xf32>
    %cst_30 = arith.constant 0.353553385 : f32
    %78 = vector.broadcast %cst_30 : f32 to vector<8x8xf32>
    %79 = arith.mulf %75, %78 : vector<8x8xf32>
    "tpu.trace_start"() <{level = 10 : i32, message = "qd,kd->qk"}> : () -> ()
    %cst_31 = arith.constant dense<0.000000e+00> : vector<8x8xf32>
    %80 = tpu.matmul %79, %76, %cst_31 {dimension_numbers = #tpu.dot_dimension_numbers<[1], [1], [0], [0], [0, 0, 1, 0], [], []>} : vector<8x8xf32>, vector<8x8xf32>, vector<8x8xf32> -> vector<8x8xf32>
    "tpu.trace_stop"() : () -> ()
    %81 = vector.broadcast %1 : vector<1x8xf32> to vector<8x8xf32>
    %82 = arith.addf %80, %81 : vector<8x8xf32>
    %cst_32 = arith.constant dense<0xFF800000> : vector<8xf32>
    %83 = vector.multi_reduction <maximumf>, %82, %cst_32 [1] : vector<8x8xf32> to vector<8xf32>
    %84 = vector.shape_cast %83 : vector<8xf32> to vector<8x1xf32>
    %85 = vector.broadcast %84 : vector<8x1xf32> to vector<8x8xf32>
    %86 = arith.subf %82, %85 : vector<8x8xf32>
    %87 = math.exp %86 : vector<8x8xf32>
    %cst_33 = arith.constant dense<0.000000e+00> : vector<8xf32>
    %88 = vector.multi_reduction <add>, %87, %cst_33 [1] : vector<8x8xf32> to vector<8xf32>
    %89 = vector.shape_cast %88 : vector<8xf32> to vector<8x1xf32>
    %90 = tpu.reciprocal %89 {approx = true} : vector<8x1xf32> -> vector<8x1xf32>
    %91 = vector.broadcast %90 : vector<8x1xf32> to vector<8x8xf32>
    %92 = arith.mulf %87, %91 : vector<8x8xf32>
    %cst_34 = arith.constant dense<0.000000e+00> : vector<8x8xf32>
    %93 = tpu.matmul %92, %77, %cst_34 {dimension_numbers = #tpu.dot_dimension_numbers<[1], [0], [0], [1], [0, 0, 1, 1], [], []>} : vector<8x8xf32>, vector<8x8xf32>, vector<8x8xf32> -> vector<8x8xf32>
    %94 = vector.extract_strided_slice %36 {offsets = [0, 24], sizes = [8, 8], strides = [1, 1]} : vector<8x96xf32> to vector<8x8xf32>
    %95 = vector.extract_strided_slice %36 {offsets = [0, 56], sizes = [8, 8], strides = [1, 1]} : vector<8x96xf32> to vector<8x8xf32>
    %96 = vector.extract_strided_slice %36 {offsets = [0, 88], sizes = [8, 8], strides = [1, 1]} : vector<8x96xf32> to vector<8x8xf32>
    %cst_35 = arith.constant 0.353553385 : f32
    %97 = vector.broadcast %cst_35 : f32 to vector<8x8xf32>
    %98 = arith.mulf %94, %97 : vector<8x8xf32>
    "tpu.trace_start"() <{level = 10 : i32, message = "qd,kd->qk"}> : () -> ()
    %cst_36 = arith.constant dense<0.000000e+00> : vector<8x8xf32>
    %99 = tpu.matmul %98, %95, %cst_36 {dimension_numbers = #tpu.dot_dimension_numbers<[1], [1], [0], [0], [0, 0, 1, 0], [], []>} : vector<8x8xf32>, vector<8x8xf32>, vector<8x8xf32> -> vector<8x8xf32>
    "tpu.trace_stop"() : () -> ()
    %100 = vector.broadcast %1 : vector<1x8xf32> to vector<8x8xf32>
    %101 = arith.addf %99, %100 : vector<8x8xf32>
    %cst_37 = arith.constant dense<0xFF800000> : vector<8xf32>
    %102 = vector.multi_reduction <maximumf>, %101, %cst_37 [1] : vector<8x8xf32> to vector<8xf32>
    %103 = vector.shape_cast %102 : vector<8xf32> to vector<8x1xf32>
    %104 = vector.broadcast %103 : vector<8x1xf32> to vector<8x8xf32>
    %105 = arith.subf %101, %104 : vector<8x8xf32>
    %106 = math.exp %105 : vector<8x8xf32>
    %cst_38 = arith.constant dense<0.000000e+00> : vector<8xf32>
    %107 = vector.multi_reduction <add>, %106, %cst_38 [1] : vector<8x8xf32> to vector<8xf32>
    %108 = vector.shape_cast %107 : vector<8xf32> to vector<8x1xf32>
    %109 = tpu.reciprocal %108 {approx = true} : vector<8x1xf32> -> vector<8x1xf32>
    %110 = vector.broadcast %109 : vector<8x1xf32> to vector<8x8xf32>
    %111 = arith.mulf %106, %110 : vector<8x8xf32>
    %cst_39 = arith.constant dense<0.000000e+00> : vector<8x8xf32>
    %112 = tpu.matmul %111, %96, %cst_39 {dimension_numbers = #tpu.dot_dimension_numbers<[1], [0], [0], [1], [0, 0, 1, 1], [], []>} : vector<8x8xf32>, vector<8x8xf32>, vector<8x8xf32> -> vector<8x8xf32>
    %113 = tpu.concatenate %55, %74, %93, %112 in 1 : vector<8x8xf32>, vector<8x8xf32>, vector<8x8xf32>, vector<8x8xf32> -> vector<8x32xf32>
    %c0_40 = arith.constant 0 : index
    %c0_41 = arith.constant 0 : index
    %c0_42 = arith.constant 0 : index
    %114 = vector.load %arg7[%c0_40, %c0_41, %c0_42] : memref<2x32x32xf32, #tpu.memory_space<vmem>>, vector<1x32x32xf32>
    %115 = vector.shape_cast %114 : vector<1x32x32xf32> to vector<32x32xf32>
    %cst_43 = arith.constant dense<0.000000e+00> : vector<8x32xf32>
    %116 = tpu.matmul %113, %115, %cst_43 {dimension_numbers = #tpu.dot_dimension_numbers<[1], [0], [0], [1], [0, 0, 1, 1], [], []>} : vector<8x32xf32>, vector<32x32xf32>, vector<8x32xf32> -> vector<8x32xf32>
    %c0_44 = arith.constant 0 : index
    %c0_45 = arith.constant 0 : index
    %c0_46 = arith.constant 0 : index
    %117 = vector.load %arg8[%c0_44, %c0_45, %c0_46] : memref<2x1x32xf32, #tpu.memory_space<vmem>>, vector<1x1x32xf32>
    %118 = vector.shape_cast %117 : vector<1x1x32xf32> to vector<1x32xf32>
    %119 = vector.broadcast %118 : vector<1x32xf32> to vector<8x32xf32>
    %120 = arith.addf %116, %119 : vector<8x32xf32>
    %121 = arith.addf %120, %29 : vector<8x32xf32>
    %c0_47 = arith.constant 0 : index
    %c0_48 = arith.constant 0 : index
    %c0_49 = arith.constant 0 : index
    %122 = vector.load %arg9[%c0_47, %c0_48, %c0_49] : memref<2x1x32xf32, #tpu.memory_space<vmem>>, vector<1x1x32xf32>
    %123 = vector.shape_cast %122 : vector<1x1x32xf32> to vector<1x32xf32>
    %c0_50 = arith.constant 0 : index
    %c0_51 = arith.constant 0 : index
    %c0_52 = arith.constant 0 : index
    %124 = vector.load %arg10[%c0_50, %c0_51, %c0_52] : memref<2x1x32xf32, #tpu.memory_space<vmem>>, vector<1x1x32xf32>
    %125 = vector.shape_cast %124 : vector<1x1x32xf32> to vector<1x32xf32>
    %cst_53 = arith.constant dense<0.000000e+00> : vector<8xf32>
    %126 = vector.multi_reduction <add>, %121, %cst_53 [1] : vector<8x32xf32> to vector<8xf32>
    %127 = vector.shape_cast %126 : vector<8xf32> to vector<8x1xf32>
    %cst_54 = arith.constant 3.200000e+01 : f32
    %128 = vector.broadcast %cst_54 : f32 to vector<8x1xf32>
    %129 = arith.divf %127, %128 : vector<8x1xf32>
    %130 = vector.broadcast %129 : vector<8x1xf32> to vector<8x32xf32>
    %131 = arith.subf %121, %130 : vector<8x32xf32>
    %132 = vector.broadcast %129 : vector<8x1xf32> to vector<8x32xf32>
    %133 = arith.subf %121, %132 : vector<8x32xf32>
    %134 = arith.mulf %131, %133 : vector<8x32xf32>
    %cst_55 = arith.constant dense<0.000000e+00> : vector<8xf32>
    %135 = vector.multi_reduction <add>, %134, %cst_55 [1] : vector<8x32xf32> to vector<8xf32>
    %136 = vector.shape_cast %135 : vector<8xf32> to vector<8x1xf32>
    %cst_56 = arith.constant 3.200000e+01 : f32
    %137 = vector.broadcast %cst_56 : f32 to vector<8x1xf32>
    %138 = arith.divf %136, %137 : vector<8x1xf32>
    %139 = vector.broadcast %129 : vector<8x1xf32> to vector<8x32xf32>
    %140 = arith.subf %121, %139 : vector<8x32xf32>
    %cst_57 = arith.constant 9.99999996E-13 : f32
    %141 = vector.broadcast %cst_57 : f32 to vector<8x1xf32>
    %142 = arith.addf %138, %141 : vector<8x1xf32>
    %143 = math.rsqrt %142 : vector<8x1xf32>
    %144 = vector.broadcast %143 : vector<8x1xf32> to vector<8x32xf32>
    %145 = arith.mulf %140, %144 : vector<8x32xf32>
    %146 = vector.broadcast %123 : vector<1x32xf32> to vector<8x32xf32>
    %147 = arith.mulf %145, %146 : vector<8x32xf32>
    %148 = vector.broadcast %125 : vector<1x32xf32> to vector<8x32xf32>
    %149 = arith.addf %147, %148 : vector<8x32xf32>
    %c0_58 = arith.constant 0 : index
    %c0_59 = arith.constant 0 : index
    %c0_60 = arith.constant 0 : index
    %150 = vector.load %arg11[%c0_58, %c0_59, %c0_60] : memref<2x32x64xf32, #tpu.memory_space<vmem>>, vector<1x32x64xf32>
    %151 = vector.shape_cast %150 : vector<1x32x64xf32> to vector<32x64xf32>
    %cst_61 = arith.constant dense<0.000000e+00> : vector<8x64xf32>
    %152 = tpu.matmul %149, %151, %cst_61 {dimension_numbers = #tpu.dot_dimension_numbers<[1], [0], [0], [1], [0, 0, 1, 1], [], []>} : vector<8x32xf32>, vector<32x64xf32>, vector<8x64xf32> -> vector<8x64xf32>
    %c0_62 = arith.constant 0 : index
    %c0_63 = arith.constant 0 : index
    %c0_64 = arith.constant 0 : index
    %153 = vector.load %arg12[%c0_62, %c0_63, %c0_64] : memref<2x1x64xf32, #tpu.memory_space<vmem>>, vector<1x1x64xf32>
    %154 = vector.shape_cast %153 : vector<1x1x64xf32> to vector<1x64xf32>
    %155 = vector.broadcast %154 : vector<1x64xf32> to vector<8x64xf32>
    %156 = arith.addf %152, %155 : vector<8x64xf32>
    %cst_65 = arith.constant 5.000000e-01 : f32
    %157 = vector.broadcast %cst_65 : f32 to vector<8x64xf32>
    %158 = arith.mulf %157, %156 : vector<8x64xf32>
    %cst_66 = arith.constant 0.707106769 : f32
    %159 = vector.broadcast %cst_66 : f32 to vector<8x64xf32>
    %160 = arith.mulf %156, %159 : vector<8x64xf32>
    %161 = math.erf %160 : vector<8x64xf32>
    %cst_67 = arith.constant 1.000000e+00 : f32
    %162 = vector.broadcast %cst_67 : f32 to vector<8x64xf32>
    %163 = arith.addf %162, %161 : vector<8x64xf32>
    %164 = arith.mulf %158, %163 : vector<8x64xf32>
    %c0_68 = arith.constant 0 : index
    %c0_69 = arith.constant 0 : index
    %c0_70 = arith.constant 0 : index
    %165 = vector.load %arg13[%c0_68, %c0_69, %c0_70] : memref<2x64x32xf32, #tpu.memory_space<vmem>>, vector<1x64x32xf32>
    %166 = vector.shape_cast %165 : vector<1x64x32xf32> to vector<64x32xf32>
    %cst_71 = arith.constant dense<0.000000e+00> : vector<8x32xf32>
    %167 = tpu.matmul %164, %166, %cst_71 {dimension_numbers = #tpu.dot_dimension_numbers<[1], [0], [0], [1], [0, 0, 1, 1], [], []>} : vector<8x64xf32>, vector<64x32xf32>, vector<8x32xf32> -> vector<8x32xf32>
    %c0_72 = arith.constant 0 : index
    %c0_73 = arith.constant 0 : index
    %c0_74 = arith.constant 0 : index
    %168 = vector.load %arg14[%c0_72, %c0_73, %c0_74] : memref<2x1x32xf32, #tpu.memory_space<vmem>>, vector<1x1x32xf32>
    %169 = vector.shape_cast %168 : vector<1x1x32xf32> to vector<1x32xf32>
    %170 = vector.broadcast %169 : vector<1x32xf32> to vector<8x32xf32>
    %171 = arith.addf %167, %170 : vector<8x32xf32>
    %172 = arith.addf %171, %149 : vector<8x32xf32>
    %c0_75 = arith.constant 0 : index
    %c0_76 = arith.constant 0 : index
    %c0_77 = arith.constant 0 : index
    %173 = vector.load %arg15[%c0_75, %c0_76, %c0_77] : memref<2x1x32xf32, #tpu.memory_space<vmem>>, vector<1x1x32xf32>
    %174 = vector.shape_cast %173 : vector<1x1x32xf32> to vector<1x32xf32>
    %c0_78 = arith.constant 0 : index
    %c0_79 = arith.constant 0 : index
    %c0_80 = arith.constant 0 : index
    %175 = vector.load %arg16[%c0_78, %c0_79, %c0_80] : memref<2x1x32xf32, #tpu.memory_space<vmem>>, vector<1x1x32xf32>
    %176 = vector.shape_cast %175 : vector<1x1x32xf32> to vector<1x32xf32>
    %cst_81 = arith.constant dense<0.000000e+00> : vector<8xf32>
    %177 = vector.multi_reduction <add>, %172, %cst_81 [1] : vector<8x32xf32> to vector<8xf32>
    %178 = vector.shape_cast %177 : vector<8xf32> to vector<8x1xf32>
    %cst_82 = arith.constant 3.200000e+01 : f32
    %179 = vector.broadcast %cst_82 : f32 to vector<8x1xf32>
    %180 = arith.divf %178, %179 : vector<8x1xf32>
    %181 = vector.broadcast %180 : vector<8x1xf32> to vector<8x32xf32>
    %182 = arith.subf %172, %181 : vector<8x32xf32>
    %183 = vector.broadcast %180 : vector<8x1xf32> to vector<8x32xf32>
    %184 = arith.subf %172, %183 : vector<8x32xf32>
    %185 = arith.mulf %182, %184 : vector<8x32xf32>
    %cst_83 = arith.constant dense<0.000000e+00> : vector<8xf32>
    %186 = vector.multi_reduction <add>, %185, %cst_83 [1] : vector<8x32xf32> to vector<8xf32>
    %187 = vector.shape_cast %186 : vector<8xf32> to vector<8x1xf32>
    %cst_84 = arith.constant 3.200000e+01 : f32
    %188 = vector.broadcast %cst_84 : f32 to vector<8x1xf32>
    %189 = arith.divf %187, %188 : vector<8x1xf32>
    %190 = vector.broadcast %180 : vector<8x1xf32> to vector<8x32xf32>
    %191 = arith.subf %172, %190 : vector<8x32xf32>
    %cst_85 = arith.constant 9.99999996E-13 : f32
    %192 = vector.broadcast %cst_85 : f32 to vector<8x1xf32>
    %193 = arith.addf %189, %192 : vector<8x1xf32>
    %194 = math.rsqrt %193 : vector<8x1xf32>
    %195 = vector.broadcast %194 : vector<8x1xf32> to vector<8x32xf32>
    %196 = arith.mulf %191, %195 : vector<8x32xf32>
    %197 = vector.broadcast %174 : vector<1x32xf32> to vector<8x32xf32>
    %198 = arith.mulf %196, %197 : vector<8x32xf32>
    %199 = vector.broadcast %176 : vector<1x32xf32> to vector<8x32xf32>
    %200 = arith.addf %198, %199 : vector<8x32xf32>
    %c1 = arith.constant 1 : index
    %c0_86 = arith.constant 0 : index
    %c0_87 = arith.constant 0 : index
    %201 = vector.load %arg5[%c1, %c0_86, %c0_87] : memref<2x32x96xf32, #tpu.memory_space<vmem>>, vector<1x32x96xf32>
    %202 = vector.shape_cast %201 : vector<1x32x96xf32> to vector<32x96xf32>
    %cst_88 = arith.constant dense<0.000000e+00> : vector<8x96xf32>
    %203 = tpu.matmul %200, %202, %cst_88 {dimension_numbers = #tpu.dot_dimension_numbers<[1], [0], [0], [1], [0, 0, 1, 1], [], []>} : vector<8x32xf32>, vector<32x96xf32>, vector<8x96xf32> -> vector<8x96xf32>
    %c1_89 = arith.constant 1 : index
    %c0_90 = arith.constant 0 : index
    %c0_91 = arith.constant 0 : index
    %204 = vector.load %arg6[%c1_89, %c0_90, %c0_91] : memref<2x1x96xf32, #tpu.memory_space<vmem>>, vector<1x1x96xf32>
    %205 = vector.shape_cast %204 : vector<1x1x96xf32> to vector<1x96xf32>
    %206 = vector.broadcast %205 : vector<1x96xf32> to vector<8x96xf32>
    %207 = arith.addf %203, %206 : vector<8x96xf32>
    %208 = vector.extract_strided_slice %207 {offsets = [0, 0], sizes = [1, 96], strides = [1, 1]} : vector<8x96xf32> to vector<1x96xf32>
    %209 = vector.extract_strided_slice %200 {offsets = [0, 0], sizes = [1, 32], strides = [1, 1]} : vector<8x32xf32> to vector<1x32xf32>
    %210 = vector.extract_strided_slice %208 {offsets = [0, 0], sizes = [1, 8], strides = [1, 1]} : vector<1x96xf32> to vector<1x8xf32>
    %211 = vector.extract_strided_slice %207 {offsets = [0, 32], sizes = [8, 8], strides = [1, 1]} : vector<8x96xf32> to vector<8x8xf32>
    %212 = vector.extract_strided_slice %207 {offsets = [0, 64], sizes = [8, 8], strides = [1, 1]} : vector<8x96xf32> to vector<8x8xf32>
    %cst_92 = arith.constant 0.353553385 : f32
    %213 = vector.broadcast %cst_92 : f32 to vector<1x8xf32>
    %214 = arith.mulf %210, %213 : vector<1x8xf32>
    "tpu.trace_start"() <{level = 10 : i32, message = "qd,kd->qk"}> : () -> ()
    %cst_93 = arith.constant dense<0.000000e+00> : vector<1x8xf32>
    %215 = tpu.matmul %214, %211, %cst_93 {dimension_numbers = #tpu.dot_dimension_numbers<[1], [1], [0], [0], [0, 0, 1, 0], [], []>} : vector<1x8xf32>, vector<8x8xf32>, vector<1x8xf32> -> vector<1x8xf32>
    "tpu.trace_stop"() : () -> ()
    %216 = arith.addf %215, %1 : vector<1x8xf32>
    %cst_94 = arith.constant dense<0xFF800000> : vector<1xf32>
    %217 = vector.multi_reduction <maximumf>, %216, %cst_94 [1] : vector<1x8xf32> to vector<1xf32>
    %218 = vector.shape_cast %217 : vector<1xf32> to vector<1x1xf32>
    %219 = vector.broadcast %218 : vector<1x1xf32> to vector<1x8xf32>
    %220 = arith.subf %216, %219 : vector<1x8xf32>
    %221 = math.exp %220 : vector<1x8xf32>
    %cst_95 = arith.constant dense<0.000000e+00> : vector<1xf32>
    %222 = vector.multi_reduction <add>, %221, %cst_95 [1] : vector<1x8xf32> to vector<1xf32>
    %223 = vector.shape_cast %222 : vector<1xf32> to vector<1x1xf32>
    %224 = tpu.reciprocal %223 {approx = true} : vector<1x1xf32> -> vector<1x1xf32>
    %225 = vector.broadcast %224 : vector<1x1xf32> to vector<1x8xf32>
    %226 = arith.mulf %221, %225 : vector<1x8xf32>
    %cst_96 = arith.constant dense<0.000000e+00> : vector<1x8xf32>
    %227 = tpu.matmul %226, %212, %cst_96 {dimension_numbers = #tpu.dot_dimension_numbers<[1], [0], [0], [1], [0, 0, 1, 1], [], []>} : vector<1x8xf32>, vector<8x8xf32>, vector<1x8xf32> -> vector<1x8xf32>
    %228 = vector.extract_strided_slice %208 {offsets = [0, 8], sizes = [1, 8], strides = [1, 1]} : vector<1x96xf32> to vector<1x8xf32>
    %229 = vector.extract_strided_slice %207 {offsets = [0, 40], sizes = [8, 8], strides = [1, 1]} : vector<8x96xf32> to vector<8x8xf32>
    %230 = vector.extract_strided_slice %207 {offsets = [0, 72], sizes = [8, 8], strides = [1, 1]} : vector<8x96xf32> to vector<8x8xf32>
    %cst_97 = arith.constant 0.353553385 : f32
    %231 = vector.broadcast %cst_97 : f32 to vector<1x8xf32>
    %232 = arith.mulf %228, %231 : vector<1x8xf32>
    "tpu.trace_start"() <{level = 10 : i32, message = "qd,kd->qk"}> : () -> ()
    %cst_98 = arith.constant dense<0.000000e+00> : vector<1x8xf32>
    %233 = tpu.matmul %232, %229, %cst_98 {dimension_numbers = #tpu.dot_dimension_numbers<[1], [1], [0], [0], [0, 0, 1, 0], [], []>} : vector<1x8xf32>, vector<8x8xf32>, vector<1x8xf32> -> vector<1x8xf32>
    "tpu.trace_stop"() : () -> ()
    %234 = arith.addf %233, %1 : vector<1x8xf32>
    %cst_99 = arith.constant dense<0xFF800000> : vector<1xf32>
    %235 = vector.multi_reduction <maximumf>, %234, %cst_99 [1] : vector<1x8xf32> to vector<1xf32>
    %236 = vector.shape_cast %235 : vector<1xf32> to vector<1x1xf32>
    %237 = vector.broadcast %236 : vector<1x1xf32> to vector<1x8xf32>
    %238 = arith.subf %234, %237 : vector<1x8xf32>
    %239 = math.exp %238 : vector<1x8xf32>
    %cst_100 = arith.constant dense<0.000000e+00> : vector<1xf32>
    %240 = vector.multi_reduction <add>, %239, %cst_100 [1] : vector<1x8xf32> to vector<1xf32>
    %241 = vector.shape_cast %240 : vector<1xf32> to vector<1x1xf32>
    %242 = tpu.reciprocal %241 {approx = true} : vector<1x1xf32> -> vector<1x1xf32>
    %243 = vector.broadcast %242 : vector<1x1xf32> to vector<1x8xf32>
    %244 = arith.mulf %239, %243 : vector<1x8xf32>
    %cst_101 = arith.constant dense<0.000000e+00> : vector<1x8xf32>
    %245 = tpu.matmul %244, %230, %cst_101 {dimension_numbers = #tpu.dot_dimension_numbers<[1], [0], [0], [1], [0, 0, 1, 1], [], []>} : vector<1x8xf32>, vector<8x8xf32>, vector<1x8xf32> -> vector<1x8xf32>
    %246 = vector.extract_strided_slice %208 {offsets = [0, 16], sizes = [1, 8], strides = [1, 1]} : vector<1x96xf32> to vector<1x8xf32>
    %247 = vector.extract_strided_slice %207 {offsets = [0, 48], sizes = [8, 8], strides = [1, 1]} : vector<8x96xf32> to vector<8x8xf32>
    %248 = vector.extract_strided_slice %207 {offsets = [0, 80], sizes = [8, 8], strides = [1, 1]} : vector<8x96xf32> to vector<8x8xf32>
    %cst_102 = arith.constant 0.353553385 : f32
    %249 = vector.broadcast %cst_102 : f32 to vector<1x8xf32>
    %250 = arith.mulf %246, %249 : vector<1x8xf32>
    "tpu.trace_start"() <{level = 10 : i32, message = "qd,kd->qk"}> : () -> ()
    %cst_103 = arith.constant dense<0.000000e+00> : vector<1x8xf32>
    %251 = tpu.matmul %250, %247, %cst_103 {dimension_numbers = #tpu.dot_dimension_numbers<[1], [1], [0], [0], [0, 0, 1, 0], [], []>} : vector<1x8xf32>, vector<8x8xf32>, vector<1x8xf32> -> vector<1x8xf32>
    "tpu.trace_stop"() : () -> ()
    %252 = arith.addf %251, %1 : vector<1x8xf32>
    %cst_104 = arith.constant dense<0xFF800000> : vector<1xf32>
    %253 = vector.multi_reduction <maximumf>, %252, %cst_104 [1] : vector<1x8xf32> to vector<1xf32>
    %254 = vector.shape_cast %253 : vector<1xf32> to vector<1x1xf32>
    %255 = vector.broadcast %254 : vector<1x1xf32> to vector<1x8xf32>
    %256 = arith.subf %252, %255 : vector<1x8xf32>
    %257 = math.exp %256 : vector<1x8xf32>
    %cst_105 = arith.constant dense<0.000000e+00> : vector<1xf32>
    %258 = vector.multi_reduction <add>, %257, %cst_105 [1] : vector<1x8xf32> to vector<1xf32>
    %259 = vector.shape_cast %258 : vector<1xf32> to vector<1x1xf32>
    %260 = tpu.reciprocal %259 {approx = true} : vector<1x1xf32> -> vector<1x1xf32>
    %261 = vector.broadcast %260 : vector<1x1xf32> to vector<1x8xf32>
    %262 = arith.mulf %257, %261 : vector<1x8xf32>
    %cst_106 = arith.constant dense<0.000000e+00> : vector<1x8xf32>
    %263 = tpu.matmul %262, %248, %cst_106 {dimension_numbers = #tpu.dot_dimension_numbers<[1], [0], [0], [1], [0, 0, 1, 1], [], []>} : vector<1x8xf32>, vector<8x8xf32>, vector<1x8xf32> -> vector<1x8xf32>
    %264 = vector.extract_strided_slice %208 {offsets = [0, 24], sizes = [1, 8], strides = [1, 1]} : vector<1x96xf32> to vector<1x8xf32>
    %265 = vector.extract_strided_slice %207 {offsets = [0, 56], sizes = [8, 8], strides = [1, 1]} : vector<8x96xf32> to vector<8x8xf32>
    %266 = vector.extract_strided_slice %207 {offsets = [0, 88], sizes = [8, 8], strides = [1, 1]} : vector<8x96xf32> to vector<8x8xf32>
    %cst_107 = arith.constant 0.353553385 : f32
    %267 = vector.broadcast %cst_107 : f32 to vector<1x8xf32>
    %268 = arith.mulf %264, %267 : vector<1x8xf32>
    "tpu.trace_start"() <{level = 10 : i32, message = "qd,kd->qk"}> : () -> ()
    %cst_108 = arith.constant dense<0.000000e+00> : vector<1x8xf32>
    %269 = tpu.matmul %268, %265, %cst_108 {dimension_numbers = #tpu.dot_dimension_numbers<[1], [1], [0], [0], [0, 0, 1, 0], [], []>} : vector<1x8xf32>, vector<8x8xf32>, vector<1x8xf32> -> vector<1x8xf32>
    "tpu.trace_stop"() : () -> ()
    %270 = arith.addf %269, %1 : vector<1x8xf32>
    %cst_109 = arith.constant dense<0xFF800000> : vector<1xf32>
    %271 = vector.multi_reduction <maximumf>, %270, %cst_109 [1] : vector<1x8xf32> to vector<1xf32>
    %272 = vector.shape_cast %271 : vector<1xf32> to vector<1x1xf32>
    %273 = vector.broadcast %272 : vector<1x1xf32> to vector<1x8xf32>
    %274 = arith.subf %270, %273 : vector<1x8xf32>
    %275 = math.exp %274 : vector<1x8xf32>
    %cst_110 = arith.constant dense<0.000000e+00> : vector<1xf32>
    %276 = vector.multi_reduction <add>, %275, %cst_110 [1] : vector<1x8xf32> to vector<1xf32>
    %277 = vector.shape_cast %276 : vector<1xf32> to vector<1x1xf32>
    %278 = tpu.reciprocal %277 {approx = true} : vector<1x1xf32> -> vector<1x1xf32>
    %279 = vector.broadcast %278 : vector<1x1xf32> to vector<1x8xf32>
    %280 = arith.mulf %275, %279 : vector<1x8xf32>
    %cst_111 = arith.constant dense<0.000000e+00> : vector<1x8xf32>
    %281 = tpu.matmul %280, %266, %cst_111 {dimension_numbers = #tpu.dot_dimension_numbers<[1], [0], [0], [1], [0, 0, 1, 1], [], []>} : vector<1x8xf32>, vector<8x8xf32>, vector<1x8xf32> -> vector<1x8xf32>
    %282 = tpu.concatenate %227, %245, %263, %281 in 1 : vector<1x8xf32>, vector<1x8xf32>, vector<1x8xf32>, vector<1x8xf32> -> vector<1x32xf32>
    %c1_112 = arith.constant 1 : index
    %c0_113 = arith.constant 0 : index
    %c0_114 = arith.constant 0 : index
    %283 = vector.load %arg7[%c1_112, %c0_113, %c0_114] : memref<2x32x32xf32, #tpu.memory_space<vmem>>, vector<1x32x32xf32>
    %284 = vector.shape_cast %283 : vector<1x32x32xf32> to vector<32x32xf32>
    %cst_115 = arith.constant dense<0.000000e+00> : vector<1x32xf32>
    %285 = tpu.matmul %282, %284, %cst_115 {dimension_numbers = #tpu.dot_dimension_numbers<[1], [0], [0], [1], [0, 0, 1, 1], [], []>} : vector<1x32xf32>, vector<32x32xf32>, vector<1x32xf32> -> vector<1x32xf32>
    %c1_116 = arith.constant 1 : index
    %c0_117 = arith.constant 0 : index
    %c0_118 = arith.constant 0 : index
    %286 = vector.load %arg8[%c1_116, %c0_117, %c0_118] : memref<2x1x32xf32, #tpu.memory_space<vmem>>, vector<1x1x32xf32>
    %287 = vector.shape_cast %286 : vector<1x1x32xf32> to vector<1x32xf32>
    %288 = arith.addf %285, %287 : vector<1x32xf32>
    %289 = arith.addf %288, %209 : vector<1x32xf32>
    %c1_119 = arith.constant 1 : index
    %c0_120 = arith.constant 0 : index
    %c0_121 = arith.constant 0 : index
    %290 = vector.load %arg9[%c1_119, %c0_120, %c0_121] : memref<2x1x32xf32, #tpu.memory_space<vmem>>, vector<1x1x32xf32>
    %291 = vector.shape_cast %290 : vector<1x1x32xf32> to vector<1x32xf32>
    %c1_122 = arith.constant 1 : index
    %c0_123 = arith.constant 0 : index
    %c0_124 = arith.constant 0 : index
    %292 = vector.load %arg10[%c1_122, %c0_123, %c0_124] : memref<2x1x32xf32, #tpu.memory_space<vmem>>, vector<1x1x32xf32>
    %293 = vector.shape_cast %292 : vector<1x1x32xf32> to vector<1x32xf32>
    %cst_125 = arith.constant dense<0.000000e+00> : vector<1xf32>
    %294 = vector.multi_reduction <add>, %289, %cst_125 [1] : vector<1x32xf32> to vector<1xf32>
    %295 = vector.shape_cast %294 : vector<1xf32> to vector<1x1xf32>
    %cst_126 = arith.constant 3.200000e+01 : f32
    %296 = vector.broadcast %cst_126 : f32 to vector<1x1xf32>
    %297 = arith.divf %295, %296 : vector<1x1xf32>
    %298 = vector.broadcast %297 : vector<1x1xf32> to vector<1x32xf32>
    %299 = arith.subf %289, %298 : vector<1x32xf32>
    %300 = vector.broadcast %297 : vector<1x1xf32> to vector<1x32xf32>
    %301 = arith.subf %289, %300 : vector<1x32xf32>
    %302 = arith.mulf %299, %301 : vector<1x32xf32>
    %cst_127 = arith.constant dense<0.000000e+00> : vector<1xf32>
    %303 = vector.multi_reduction <add>, %302, %cst_127 [1] : vector<1x32xf32> to vector<1xf32>
    %304 = vector.shape_cast %303 : vector<1xf32> to vector<1x1xf32>
    %cst_128 = arith.constant 3.200000e+01 : f32
    %305 = vector.broadcast %cst_128 : f32 to vector<1x1xf32>
    %306 = arith.divf %304, %305 : vector<1x1xf32>
    %307 = vector.broadcast %297 : vector<1x1xf32> to vector<1x32xf32>
    %308 = arith.subf %289, %307 : vector<1x32xf32>
    %cst_129 = arith.constant 9.99999996E-13 : f32
    %309 = vector.broadcast %cst_129 : f32 to vector<1x1xf32>
    %310 = arith.addf %306, %309 : vector<1x1xf32>
    %311 = math.rsqrt %310 : vector<1x1xf32>
    %312 = vector.broadcast %311 : vector<1x1xf32> to vector<1x32xf32>
    %313 = arith.mulf %308, %312 : vector<1x32xf32>
    %314 = arith.mulf %313, %291 : vector<1x32xf32>
    %315 = arith.addf %314, %293 : vector<1x32xf32>
    %c1_130 = arith.constant 1 : index
    %c0_131 = arith.constant 0 : index
    %c0_132 = arith.constant 0 : index
    %316 = vector.load %arg11[%c1_130, %c0_131, %c0_132] : memref<2x32x64xf32, #tpu.memory_space<vmem>>, vector<1x32x64xf32>
    %317 = vector.shape_cast %316 : vector<1x32x64xf32> to vector<32x64xf32>
    %cst_133 = arith.constant dense<0.000000e+00> : vector<1x64xf32>
    %318 = tpu.matmul %315, %317, %cst_133 {dimension_numbers = #tpu.dot_dimension_numbers<[1], [0], [0], [1], [0, 0, 1, 1], [], []>} : vector<1x32xf32>, vector<32x64xf32>, vector<1x64xf32> -> vector<1x64xf32>
    %c1_134 = arith.constant 1 : index
    %c0_135 = arith.constant 0 : index
    %c0_136 = arith.constant 0 : index
    %319 = vector.load %arg12[%c1_134, %c0_135, %c0_136] : memref<2x1x64xf32, #tpu.memory_space<vmem>>, vector<1x1x64xf32>
    %320 = vector.shape_cast %319 : vector<1x1x64xf32> to vector<1x64xf32>
    %321 = arith.addf %318, %320 : vector<1x64xf32>
    %cst_137 = arith.constant 5.000000e-01 : f32
    %322 = vector.broadcast %cst_137 : f32 to vector<1x64xf32>
    %323 = arith.mulf %322, %321 : vector<1x64xf32>
    %cst_138 = arith.constant 0.707106769 : f32
    %324 = vector.broadcast %cst_138 : f32 to vector<1x64xf32>
    %325 = arith.mulf %321, %324 : vector<1x64xf32>
    %326 = math.erf %325 : vector<1x64xf32>
    %cst_139 = arith.constant 1.000000e+00 : f32
    %327 = vector.broadcast %cst_139 : f32 to vector<1x64xf32>
    %328 = arith.addf %327, %326 : vector<1x64xf32>
    %329 = arith.mulf %323, %328 : vector<1x64xf32>
    %c1_140 = arith.constant 1 : index
    %c0_141 = arith.constant 0 : index
    %c0_142 = arith.constant 0 : index
    %330 = vector.load %arg13[%c1_140, %c0_141, %c0_142] : memref<2x64x32xf32, #tpu.memory_space<vmem>>, vector<1x64x32xf32>
    %331 = vector.shape_cast %330 : vector<1x64x32xf32> to vector<64x32xf32>
    %cst_143 = arith.constant dense<0.000000e+00> : vector<1x32xf32>
    %332 = tpu.matmul %329, %331, %cst_143 {dimension_numbers = #tpu.dot_dimension_numbers<[1], [0], [0], [1], [0, 0, 1, 1], [], []>} : vector<1x64xf32>, vector<64x32xf32>, vector<1x32xf32> -> vector<1x32xf32>
    %c1_144 = arith.constant 1 : index
    %c0_145 = arith.constant 0 : index
    %c0_146 = arith.constant 0 : index
    %333 = vector.load %arg14[%c1_144, %c0_145, %c0_146] : memref<2x1x32xf32, #tpu.memory_space<vmem>>, vector<1x1x32xf32>
    %334 = vector.shape_cast %333 : vector<1x1x32xf32> to vector<1x32xf32>
    %335 = arith.addf %332, %334 : vector<1x32xf32>
    %336 = arith.addf %335, %315 : vector<1x32xf32>
    %c1_147 = arith.constant 1 : index
    %c0_148 = arith.constant 0 : index
    %c0_149 = arith.constant 0 : index
    %337 = vector.load %arg15[%c1_147, %c0_148, %c0_149] : memref<2x1x32xf32, #tpu.memory_space<vmem>>, vector<1x1x32xf32>
    %338 = vector.shape_cast %337 : vector<1x1x32xf32> to vector<1x32xf32>
    %c1_150 = arith.constant 1 : index
    %c0_151 = arith.constant 0 : index
    %c0_152 = arith.constant 0 : index
    %339 = vector.load %arg16[%c1_150, %c0_151, %c0_152] : memref<2x1x32xf32, #tpu.memory_space<vmem>>, vector<1x1x32xf32>
    %340 = vector.shape_cast %339 : vector<1x1x32xf32> to vector<1x32xf32>
    %cst_153 = arith.constant dense<0.000000e+00> : vector<1xf32>
    %341 = vector.multi_reduction <add>, %336, %cst_153 [1] : vector<1x32xf32> to vector<1xf32>
    %342 = vector.shape_cast %341 : vector<1xf32> to vector<1x1xf32>
    %cst_154 = arith.constant 3.200000e+01 : f32
    %343 = vector.broadcast %cst_154 : f32 to vector<1x1xf32>
    %344 = arith.divf %342, %343 : vector<1x1xf32>
    %345 = vector.broadcast %344 : vector<1x1xf32> to vector<1x32xf32>
    %346 = arith.subf %336, %345 : vector<1x32xf32>
    %347 = vector.broadcast %344 : vector<1x1xf32> to vector<1x32xf32>
    %348 = arith.subf %336, %347 : vector<1x32xf32>
    %349 = arith.mulf %346, %348 : vector<1x32xf32>
    %cst_155 = arith.constant dense<0.000000e+00> : vector<1xf32>
    %350 = vector.multi_reduction <add>, %349, %cst_155 [1] : vector<1x32xf32> to vector<1xf32>
    %351 = vector.shape_cast %350 : vector<1xf32> to vector<1x1xf32>
    %cst_156 = arith.constant 3.200000e+01 : f32
    %352 = vector.broadcast %cst_156 : f32 to vector<1x1xf32>
    %353 = arith.divf %351, %352 : vector<1x1xf32>
    %354 = vector.broadcast %344 : vector<1x1xf32> to vector<1x32xf32>
    %355 = arith.subf %336, %354 : vector<1x32xf32>
    %cst_157 = arith.constant 9.99999996E-13 : f32
    %356 = vector.broadcast %cst_157 : f32 to vector<1x1xf32>
    %357 = arith.addf %353, %356 : vector<1x1xf32>
    %358 = math.rsqrt %357 : vector<1x1xf32>
    %359 = vector.broadcast %358 : vector<1x1xf32> to vector<1x32xf32>
    %360 = arith.mulf %355, %359 : vector<1x32xf32>
    %361 = arith.mulf %360, %338 : vector<1x32xf32>
    %362 = arith.addf %361, %340 : vector<1x32xf32>
    %c0_158 = arith.constant 0 : index
    %c0_159 = arith.constant 0 : index
    %c0_160 = arith.constant 0 : index
    %363 = vector.load %arg17[%c0_158, %c0_159, %c0_160] : memref<1x1x32xf32, #tpu.memory_space<vmem>>, vector<1x1x32xf32>
    %364 = vector.shape_cast %363 : vector<1x1x32xf32> to vector<1x32xf32>
    %365 = vector.shape_cast %362 : vector<1x32xf32> to vector<1x1x32xf32>
    tpu.vector_store %arg17[%c0_158, %c0_159, %c0_160], %365 {strides = array<i32>} : memref<1x1x32xf32, #tpu.memory_space<vmem>>, vector<1x1x32xf32>,
    return
  }
  func.func @transform_0(%arg0: i32) -> (i32, i32, i32) {
    %c0_i32 = arith.constant 0 : i32
    %c0_i32_0 = arith.constant 0 : i32
    %c0_i32_1 = arith.constant 0 : i32
    return %arg0, %c0_i32, %c0_i32_0 : i32, i32, i32
  }
  func.func @transform_1(%arg0: i32) -> (i32, i32, i32) {
    %c0_i32 = arith.constant 0 : i32
    %c0_i32_0 = arith.constant 0 : i32
    %c0_i32_1 = arith.constant 0 : i32
    return %arg0, %c0_i32, %c0_i32_0 : i32, i32, i32
  }
  func.func @transform_2(%arg0: i32) -> (i32, i32) {
    %c0_i32 = arith.constant 0 : i32
    %c0_i32_0 = arith.constant 0 : i32
    %c0_i32_1 = arith.constant 0 : i32
    return %c0_i32, %c0_i32_0 : i32, i32
  }
  func.func @transform_3(%arg0: i32) -> (i32, i32) {
    %c0_i32 = arith.constant 0 : i32
    %c0_i32_0 = arith.constant 0 : i32
    %c0_i32_1 = arith.constant 0 : i32
    return %c0_i32, %c0_i32_0 : i32, i32
  }
  func.func @transform_4(%arg0: i32) -> (i32, i32, i32) {
    %c0_i32 = arith.constant 0 : i32
    %c0_i32_0 = arith.constant 0 : i32
    %c0_i32_1 = arith.constant 0 : i32
    %c0_i32_2 = arith.constant 0 : i32
    return %c0_i32, %c0_i32_0, %c0_i32_1 : i32, i32, i32
  }
  func.func @transform_5(%arg0: i32) -> (i32, i32, i32) {
    %c0_i32 = arith.constant 0 : i32
    %c0_i32_0 = arith.constant 0 : i32
    %c0_i32_1 = arith.constant 0 : i32
    %c0_i32_2 = arith.constant 0 : i32
    return %c0_i32, %c0_i32_0, %c0_i32_1 : i32, i32, i32
  }
  func.func @transform_6(%arg0: i32) -> (i32, i32, i32) {
    %c0_i32 = arith.constant 0 : i32
    %c0_i32_0 = arith.constant 0 : i32
    %c0_i32_1 = arith.constant 0 : i32
    %c0_i32_2 = arith.constant 0 : i32
    return %c0_i32, %c0_i32_0, %c0_i32_1 : i32, i32, i32
  }
  func.func @transform_7(%arg0: i32) -> (i32, i32, i32) {
    %c0_i32 = arith.constant 0 : i32
    %c0_i32_0 = arith.constant 0 : i32
    %c0_i32_1 = arith.constant 0 : i32
    %c0_i32_2 = arith.constant 0 : i32
    return %c0_i32, %c0_i32_0, %c0_i32_1 : i32, i32, i32
  }
  func.func @transform_8(%arg0: i32) -> (i32, i32, i32) {
    %c0_i32 = arith.constant 0 : i32
    %c0_i32_0 = arith.constant 0 : i32
    %c0_i32_1 = arith.constant 0 : i32
    %c0_i32_2 = arith.constant 0 : i32
    return %c0_i32, %c0_i32_0, %c0_i32_1 : i32, i32, i32
  }
  func.func @transform_9(%arg0: i32) -> (i32, i32, i32) {
    %c0_i32 = arith.constant 0 : i32
    %c0_i32_0 = arith.constant 0 : i32
    %c0_i32_1 = arith.constant 0 : i32
    %c0_i32_2 = arith.constant 0 : i32
    return %c0_i32, %c0_i32_0, %c0_i32_1 : i32, i32, i32
  }
  func.func @transform_10(%arg0: i32) -> (i32, i32, i32) {
    %c0_i32 = arith.constant 0 : i32
    %c0_i32_0 = arith.constant 0 : i32
    %c0_i32_1 = arith.constant 0 : i32
    %c0_i32_2 = arith.constant 0 : i32
    return %c0_i32, %c0_i32_0, %c0_i32_1 : i32, i32, i32
  }
  func.func @transform_11(%arg0: i32) -> (i32, i32, i32) {
    %c0_i32 = arith.constant 0 : i32
    %c0_i32_0 = arith.constant 0 : i32
    %c0_i32_1 = arith.constant 0 : i32
    %c0_i32_2 = arith.constant 0 : i32
    return %c0_i32, %c0_i32_0, %c0_i32_1 : i32, i32, i32
  }
  func.func @transform_12(%arg0: i32) -> (i32, i32, i32) {
    %c0_i32 = arith.constant 0 : i32
    %c0_i32_0 = arith.constant 0 : i32
    %c0_i32_1 = arith.constant 0 : i32
    %c0_i32_2 = arith.constant 0 : i32
    return %c0_i32, %c0_i32_0, %c0_i32_1 : i32, i32, i32
  }
  func.func @transform_13(%arg0: i32) -> (i32, i32, i32) {
    %c0_i32 = arith.constant 0 : i32
    %c0_i32_0 = arith.constant 0 : i32
    %c0_i32_1 = arith.constant 0 : i32
    %c0_i32_2 = arith.constant 0 : i32
    return %c0_i32, %c0_i32_0, %c0_i32_1 : i32, i32, i32
  }
  func.func @transform_14(%arg0: i32) -> (i32, i32, i32) {
    %c0_i32 = arith.constant 0 : i32
    %c0_i32_0 = arith.constant 0 : i32
    %c0_i32_1 = arith.constant 0 : i32
    %c0_i32_2 = arith.constant 0 : i32
    return %c0_i32, %c0_i32_0, %c0_i32_1 : i32, i32, i32
  }
  func.func @transform_15(%arg0: i32) -> (i32, i32, i32) {
    %c0_i32 = arith.constant 0 : i32
    %c0_i32_0 = arith.constant 0 : i32
    %c0_i32_1 = arith.constant 0 : i32
    %c0_i32_2 = arith.constant 0 : i32
    return %c0_i32, %c0_i32_0, %c0_i32_1 : i32, i32, i32
  }
  func.func @transform_16(%arg0: i32) -> (i32, i32, i32) {
    %c0_i32 = arith.constant 0 : i32
    %c0_i32_0 = arith.constant 0 : i32
    %c0_i32_1 = arith.constant 0 : i32
    return %arg0, %c0_i32, %c0_i32_0 : i32, i32, i32
  }
}

</mosaic_0001>

<bundles_post_ra>
// kernel: distilbert_cls.1
= control target key start
LH: loop header
LB: loop body
LE: loop exit
PB: predicated region body
PF: predicated region fallthrough
CT: control target
= control target key end

     0   :  { %s3952_s0 = inlined_call_operand.vmem [shape: f32[2,8,32], index: 0, kind: input, shape index: {}]   ;;  %s3953_s1 = inlined_call_operand.vmem [shape: f32[2,1,8], index: 1, kind: input, shape index: {}]   ;;  %s3954_s2 = inlined_call_operand.vmem [shape: f32[1,32], index: 2, kind: input, shape index: {}]   ;;  %s3955_s3 = inlined_call_operand.vmem [shape: f32[1,32], index: 3, kind: input, shape index: {}]   ;;  %s3956_s4 = inlined_call_operand.vmem [shape: f32[2,32,96], index: 4, kind: input, shape index: {}]   ;;  %s3957_s5 = inlined_call_operand.vmem [shape: f32[2,1,96], index: 5, kind: input, shape index: {}]   ;;  %s3958_s6 = inlined_call_operand.vmem [shape: f32[2,32,32], index: 6, kind: input, shape index: {}]   ;;  %s3959_s7 = inlined_call_operand.vmem [shape: f32[2,1,32], index: 7, kind: input, shape index: {}]   ;;  %s3960_s8 = inlined_call_operand.vmem [shape: f32[2,1,32], index: 8, kind: input, shape index: {}]   ;;  %s3961_s9 = inlined_call_operand.vmem [shape: f32[2,1,32], index: 9, kind: input, shape index: {}]   ;;  %s3962_s10 = inlined_call_operand.vmem [shape: f32[2,32,64], index: 10, kind: input, shape index: {}]   ;;  %s3963_s11 = inlined_call_operand.vmem [shape: f32[2,1,64], index: 11, kind: input, shape index: {}]   ;;  %s3964_s12 = inlined_call_operand.vmem [shape: f32[2,64,32], index: 12, kind: input, shape index: {}]   ;;  %s3965_s13 = inlined_call_operand.vmem [shape: f32[2,1,32], index: 13, kind: input, shape index: {}]   ;;  %s3966_s14 = inlined_call_operand.vmem [shape: f32[2,1,32], index: 14, kind: input, shape index: {}]   ;;  %s3967_s15 = inlined_call_operand.vmem [shape: f32[2,1,32], index: 15, kind: input, shape index: {}]   ;;  %s3968_s16 = inlined_call_operand.hbm [shape: f32[2,1,32], index: 16, kind: output, shape index: {}]  }
   0x1   :  { %3985 = sst [smem:[#allocation9_spill]] %s3952_s0 }
   0x2   :  { %3986 = sst [smem:[#allocation10_spill]] %s3953_s1 }
   0x3   :  { %21 = vsyncpa [#allocation3], 0 }
   0x4   :  { %23 = vsyncpa [#allocation3 + $0x1], 0  ;;  %s3457_s21 = smov 0   ;;  %s3459_s22 = smov 0  }
   0x5   :  { %s3461_s23 = smov 0   ;;  %s3463_s24 = smov 0  }
   0x6 LB: > { %3987 = sst [smem:[#allocation5_spill]] %s3348_s23  ;;  %s3478_s25 = sadd.s32 4294967295, %s3352_s24   ;;  %s3352_s24 = sphi %s3463_s24, %s4008_s24   ;;  %s3348_s23 = sphi %s3461_s23, %s4010_s23   ;;  %s3344_s22 = sphi %s3459_s22, %s4012_s22   ;;  %s3340_s21 = sphi %s3457_s21, %s4011_s21  }
   0x7   : > { %s2785_s26 = sadd.s32 4294967294, %s3352_s24   ;;  %s3482_s27 = sadd.s32 1, %s3352_s24  }
   0x8   : > { %3988 = sst [smem:[#allocation6_spill]] %s3482_s27  ;;  %s382_s28 = sadd.s32 1, %s3348_s23 }
   0x9   : > { %s379_s29 = ssub.s32 %s3352_s24, %s3482_s27  ;;  %p392_p0 = scmp.ne.s32.totalorder %s3348_s23, %s3344_s22 }
   0xa   : > { %p380_p1 = scmp.eq.s32.totalorder %s379_s29, 0  ;;  %p393_p2 = scmp.eq.s32.totalorder %s3478_s25, 1 }
   0xb   : > { %p398_p3 = scmp.ne.s32.totalorder %s3344_s22, %s3340_s21  ;;  %p399_p4 = scmp.eq.s32.totalorder %s2785_s26, 1 }
   0xc   : > { %s3493_s30 = scalar_select %p380_p1, %s3348_s23, %s382_s28  }
   0xd   : > { %p3495_p5 = por %p393_p2, %p392_p0  ;;  %p3499_p6 = por %p399_p4, %p398_p3 }
   0xe   : > { %3989 = sst [smem:[#allocation7_spill]] %s3493_s30  ;;  %p2788_p7 = scmp.ge.s32.totalorder %s3352_s24, 1 }
   0xf   : > { %s3991_s17 = scalar_select %p3499_p6, 1, 0 }
  0x10   : > { %p472_p8 = scmp.lt.s32.totalorder %s3352_s24, 3 }
  0x11   : > { %3992 = sst [smem:[#allocation8_spill]] %s3991_s17 }
  0x12   : > { %p473_p9 = pnand %p2788_p7, %p472_p8 }
  0x13   : > { %p523_p10 = scmp.lt.s32.totalorder (!%p473_p9), %s3478_s25, 1  ;;  %vm534_vm0 = vcmask (!%p473_p9), 261120   ;;  %s3993_s28 = sld [smem:[#allocation9_spill]] (!%p473_p9)  ;;  %v563_v7 = vld [vmem:[%s3956_s4] sm:$0xff] (!%p473_p9)  ;;  %v564_v8 = vld [vmem:[%s3956_s4 + $0x8] sm:$0xff] (!%p473_p9)  ;;  %v565_v9 = vld [vmem:[%s3956_s4 + $0x10] sm:$0xff] (!%p473_p9)  ;;  %v649_v36 = vlaneseq (!%p473_p9) }
  0x14   : > { %476 = sbr.rel (%p473_p9) target bundleno = 5342 (0x14de), region = 84  ;;  %v3354_v10 = vmov (!%p473_p9), 0.0|0.0   ;;  %v3129_v11 = vpack.c.bf16 (!%p473_p9), %v564_v8, %v563_v7  ;;  %v566_v12 = vld [vmem:[%s3956_s4 + $0x18] sm:$0xff] (!%p473_p9)  ;;  %vm3355_vm1 = vmmov (!%p473_p9), 0   ;;  %v3356_v13 = vmov (!%p473_p9), 0.0   ;;  %s3357_s20 = smov (!%p473_p9), 96  }
  0x15   : > { %3128 = vmatprep.subr.bf16.mxu1 (!%p473_p9), %v3354_v10  ;;  %2952 = vmatprep.mubr.msk.f32.mxu1 (!%p473_p9), %vm3355_vm1, %v3356_v13  ;;  %v3132_v14 = vpack.c.bf16 (!%p473_p9), %v566_v12, %v565_v9  ;;  %v2790_v19 = vld [vmem:[%s3954_s2] ss:$0 sm:$0xff] (!%p473_p9)  ;;  %s3980_s26 = smov (!%p473_p9), 120   ;;  %s3981_s23 = smov (!%p473_p9), 80   ;;  %vm657_vm2 = vcmask (!%p473_p9), 64512   ;;  %v650_v37 = vshrl.u32 (!%p473_p9), %v649_v36, 7 }
  0x16   : > { %2965 = vmatprep.subr.mxu0 (!%p473_p9), %v3356_v13  ;;  %2967 = vmatprep.mubr.msk.f32.mxu0 (!%p473_p9), %vm3355_vm1, %v3356_v13  ;;  %v2791_v21 = vld [vmem:[%s3955_s3] ss:$0 sm:$0xff] (!%p473_p9)  ;;  %s3979_s27 = smov (!%p473_p9), 72   ;;  %s3978_s30 = smov (!%p473_p9), 112   ;;  %vm1328_vm3 = vcmask (!%p473_p9), 130048   ;;  %vm1330_vm4 = vcmask (!%p473_p9), 195584  }
  0x17   : > { %3130 = vmatpush3.bf16.msra.mxu1 (!%p473_p9), %v3129_v11  ;;  %v2792_v24 = vld [vmem:[%s3957_s5] ss:$0 sm:$0xff] (!%p473_p9)  ;;  %s3973_s17 = smov (!%p473_p9), 104   ;;  %s3994_s1 = sld [smem:[#allocation10_spill]] (!%p473_p9)  ;;  %v651_v38 = vsub.s32 (!%p473_p9), 0, %v650_v37  ;;  %v1334_v37 = vld [vmem:[%s3958_s6 + $0x10] sm:$0xff] (!%p473_p9) }
  0x18   : > { %3131 = vmatprep.subr.bf16.mxu1 (!%p473_p9), %v3354_v10  ;;  %vm1550_vm5 = vcmask (!%p473_p9), 523264   ;;  %vm1819_vm6 = vcmask (!%p473_p9), 57344   ;;  %vm2502_vm7 = vcmask (!%p473_p9), 253952  }
  0x1b   : > { %s3507_s18 = scalar_select %p523_p10, %s3478_s25, 1  ;;  %3133 = vmatpush3.bf16.msra.mxu1 %v3132_v14 }
  0x1c   : > { %2955 = vmatprep.subr.mxu1 %v3356_v13 }
  0x1d   : > { %s2789_s19 = sshll.u32 %s3507_s18, 3 }
  0x1e   : > { %s526_s29 = scalar_lea.vmem %s3993_s28, %s2789_s19  ;;  %s3359_s28 = smov 88  }
  0x1f   : > { %v531_v0 = vld [vmem:[%s526_s29] sm:$0xff]  ;;  %s3975_s29 = smov 40   ;;  %s3974_s19 = smov 56  }
  0x20   : > { %v535_v1 = vsel %vm534_vm0, %v531_v0, 0.0 }
  0x21   : > { %536 = vadd.xlane.f32.xlu0 %v535_v1 }
  0xae   : > { %v537_v2 = vpop.xlane.xlu0 %536 }
  0xaf   : > { %v539_v3 = vmul.f32 0.03125, %v537_v2 }
  0xb1   : > { %v540_v4 = vsub.f32 %v531_v0, %v539_v3 }
  0xb3   : > { %v541_v5 = vmul.f32 %v540_v4, %v540_v4 }
  0xb5   : > { %v542_v6 = vsel %vm534_vm0, %v541_v5, 0.0 }
  0xb6   : > { %543 = vadd.xlane.f32.xlu0 %v542_v6 }
 0x143   : > { %v544_v15 = vpop.xlane.xlu0 %543 }
 0x144   : > { %v545_v16 = vmul.f32 0.03125, %v544_v15 }
 0x146   : > { %v546_v17 = vadd.f32 1e-12, %v545_v16 }
 0x148   : > { %3244 = vrsqrt.f32 %v546_v17 }
 0x152   : > { %v3245_v18 = vpop.eup %3244 }
 0x153   : > { %v548_v20 = vmul.f32 %v3245_v18, %v540_v4 }
 0x155   : > { %v555_v22 = vmul.f32 %v2790_v19, %v548_v20 }
 0x157   : > { %v3541_v23 = vadd.f32 %v2791_v21, %v555_v22 }
 0x159   : > { %2953 = vmatmul.mubr.msk.f32.vlgmr.msra.gmra.mrb[0].mxu1 %vm534_vm0, %v3541_v23 }
 0x15a   : > { %2957 = vmatprep.mubr.msk.f32.mxu1 %vm3355_vm1, %v3356_v13 }
 0x22c   : > { %v643_v25 = vpop.f32.mrb[0].mxu1 }
 0x22d   : > { %v3550_v26 = vadd.f32 %v2792_v24, %v643_v25  ;;  %v2954_v27 = vpop.f32.mrb[1].mxu1 }
 0x22f   : > { %655 = vrot.lane.b32.xlu1 %v3550_v26, %s3357_s20  ;;  %v647_v28 = vmul.f32 0.35355338, %v3550_v26 }
 0x231   : > { %820 = vrot.lane.b32.xlu0 %v647_v28, %s3980_s26  ;;  %s3995_s26 = smov 80  }
 0x233   : > { %822 = vrot.lane.b32.xlu1 %v3550_v26, %s3359_s28 }
 0x237   : > { %987 = vrot.lane.b32.xlu1 %v3550_v26, %s3981_s23  ;;  %s3996_s23 = smov 120  }
 0x23b   : > { %1152 = vrot.lane.b32.xlu1 %v3550_v26, %s3979_s27  ;;  %s3982_s27 = smov 24  }
 0x23f   : > { %985 = vrot.lane.b32.xlu1 %v647_v28, %s3978_s30  ;;  %s3997_s30 = smov 72  }
 0x243   : > { %1150 = vrot.lane.b32.xlu1 %v647_v28, %s3973_s17  ;;  %s529_s17 = scalar_lea.vmem %s3994_s1, %s3507_s18  ;;  %s3977_s18 = smov 64  }
 0x244   : > { %v3588_v39 = vld [vmem:[%s529_s17] sm:$0x1]  ;;  %s3976_s17 = smov 48  }
 0x245   : > { %v652_v40 = vrot.slane %v3588_v39, %v651_v38  ;;  %v1335_v38 = vld [vmem:[%s3958_s6 + $0x18] sm:$0xff] }
 0x2a1   : > { %v656_v29 = vpop.permute.xlu1 %655 }
 0x2a2   : > { %2956 = vmatpush3.xpose.msk.msra.mxu1 %vm657_vm2, %v656_v29 }
 0x2a3   : > { %2960 = vmatprep.subr.mxu1 %v3356_v13  ;;  %v821_v31 = vpop.permute.xlu0 %820 }
 0x2a5   : > { %v823_v30 = vpop.permute.xlu1 %822  ;;  %2958 = vmatmul.mubr.msk.f32.vlgmr.msra.gmra.mrb[2].mxu1 %vm657_vm2, %v647_v28 }
 0x2a6   : > { %2966 = vmatpush3.xpose.msk.msra.mxu0 %vm657_vm2, %v823_v30  ;;  %2962 = vmatprep.mubr.msk.f32.mxu1 %vm3355_vm1, %v3356_v13 }
 0x2a7   : > { %2975 = vmatprep.subr.mxu0 %v3356_v13 }
 0x2a9   : > { %v988_v32 = vpop.permute.xlu1 %987  ;;  %2968 = vmatmul.mubr.msk.f32.vlgmr.msra.gmra.mrb[0].mxu0 %vm657_vm2, %v821_v31 }
 0x2aa   : > { %2976 = vmatpush3.xpose.msk.msra.mxu0 %vm657_vm2, %v988_v32  ;;  %2977 = vmatprep.mubr.msk.f32.mxu0 %vm3355_vm1, %v3356_v13  ;;  %v1332_v32 = vld [vmem:[%s3958_s6] sm:$0xff] }
 0x2ab   : > { %2985 = vmatprep.subr.mxu0 %v3356_v13 }
 0x2ad   : > { %v1153_v33 = vpop.permute.xlu1 %1152 }
 0x2b1   : > { %v986_v34 = vpop.permute.xlu1 %985 }
 0x2b2   : > { %2978 = vmatmul.mubr.msk.f32.vlgmr.msra.gmra.mrb[2].mxu0 %vm657_vm2, %v986_v34 }
 0x2b3   : > { %2986 = vmatpush3.xpose.msk.msra.mxu0 %vm657_vm2, %v1153_v33  ;;  %2987 = vmatprep.mubr.msk.f32.mxu0 %vm3355_vm1, %v3356_v13  ;;  %v1333_v33 = vld [vmem:[%s3958_s6 + $0x8] sm:$0xff] }
 0x2b4   : > { %3134 = vmatprep.subr.bf16.mxu0 %v3354_v10  ;;  %v3135_v34 = vpack.c.bf16 %v1333_v33, %v1332_v32 }
 0x2b5   : > { %v1151_v35 = vpop.permute.xlu1 %1150 }
 0x2b6   : > { %2988 = vmatmul.mubr.msk.f32.vlgmr.msra.gmra.mrb[4].mxu0 %vm657_vm2, %v1151_v35 }
 0x2b7   : > { %3003 = vmatprep.mubr.msk.f32.mxu0 %vm3355_vm1, %v3356_v13  ;;  %3136 = vmatpush3.bf16.msra.mxu0 %v3135_v34 }
 0x2b8   : > { %3137 = vmatprep.subr.bf16.mxu0 %v3354_v10 }
 0x378   : > { %v729_v41 = vpop.f32.mrb[2].mxu1 }
 0x379   : > { %v730_v42 = vadd.f32 %v729_v41, %v652_v40  ;;  %v2959_v43 = vpop.f32.mrb[3].mxu1 }
 0x37b   : > { %v733_v44 = vsel %vm657_vm2, %v730_v42, -inf }
 0x37c   : > { %v894_v45 = vpop.f32.mrb[0].mxu0  ;;  %734 = vmax.xlane.f32.xlu1 %v733_v44 }
 0x37d   : > { %v895_v46 = vadd.f32 %v894_v45, %v652_v40  ;;  %v2969_v47 = vpop.f32.mrb[1].mxu0 }
 0x37f   : > { %v898_v48 = vsel %vm657_vm2, %v895_v46, -inf }
 0x380   : > { %899 = vmax.xlane.f32.xlu0 %v898_v48 }
 0x385   : > { %v1059_v49 = vpop.f32.mrb[2].mxu0 }
 0x386   : > { %v1060_v50 = vadd.f32 %v1059_v49, %v652_v40  ;;  %v2979_v51 = vpop.f32.mrb[3].mxu0 }
 0x388   : > { %v1063_v52 = vsel %vm657_vm2, %v1060_v50, -inf }
 0x389   : > { %v1224_v53 = vpop.f32.mrb[4].mxu0  ;;  %1064 = vmax.xlane.f32.xlu1 %v1063_v52 }
 0x38a   : > { %v1225_v54 = vadd.f32 %v1224_v53, %v652_v40  ;;  %v2989_v55 = vpop.f32.mrb[5].mxu0  ;;  %v3138_v40 = vpack.c.bf16 %v1335_v38, %v1334_v37  ;;  %v2806_v53 = vld [vmem:[%s3959_s7] ss:$0 sm:$0xff] }
 0x38b   : > { %v2812_v38 = vld [vmem:[%s3965_s13] ss:$0 sm:$0xff] }
 0x38c   : > { %v1228_v56 = vsel %vm657_vm2, %v1225_v54, -inf  ;;  %3139 = vmatpush3.bf16.msra.mxu0 %v3138_v40 }
 0x38d   : > { %1229 = vmax.xlane.f32.xlu0 %v1228_v56  ;;  %3146 = vmatprep.subr.bf16.mxu0 %v3354_v10 }
 0x39a   : > { %744 = vrot.lane.b32.xlu1 %v3550_v26, %s3977_s18  ;;  %s3984_s18 = smov 8  }
 0x409   : > { %v735_v57 = vpop.xlane.xlu1 %734 }
 0x40a   : > { %v736_v58 = vsub.f32 %v730_v42, %v735_v57 }
 0x40c   : > { %v737_v59 = vmul.f32 1.442695, %v736_v58 }
 0x40d   : > { %v900_v60 = vpop.xlane.xlu0 %899 }
 0x40e   : > { %3246 = vpow2.f32 %v737_v59  ;;  %v901_v61 = vsub.f32 %v895_v46, %v900_v60 }
 0x410   : > { %v902_v62 = vmul.f32 1.442695, %v901_v61 }
 0x412   : > { %3248 = vpow2.f32 %v902_v62 }
 0x416   : > { %v1065_v63 = vpop.xlane.xlu1 %1064 }
 0x417   : > { %v1066_v0 = vsub.f32 %v1060_v50, %v1065_v63 }
 0x418   : > { %v3247_v1 = vpop.eup %3246 }
 0x419   : > { %v1067_v2 = vmul.f32 1.442695, %v1066_v0  ;;  %v739_v3 = vsel %vm657_vm2, %v3247_v1, 0.0  ;;  %v1446_v0 = vld [vmem:[%s3962_s10] sm:$0xff] }
 0x41a   : > { %v1230_v4 = vpop.xlane.xlu0 %1229  ;;  %740 = vadd.xlane.f32.xlu1 %v739_v3  ;;  %v745_v5 = vpop.permute.xlu1 %744  ;;  %v1449_v3 = vld [vmem:[%s3962_s10 + $0x18] sm:$0xff] }
 0x41b   : > { %3250 = vpow2.f32 %v1067_v2  ;;  %v1231_v6 = vsub.f32 %v1225_v54, %v1230_v4  ;;  %2961 = vmatpush3.msra.mxu1 %v745_v5 }
 0x41c   : > { %v3249_v7 = vpop.eup %3248  ;;  %2970 = vmatprep.subr.mxu1 %v3356_v13 }
 0x41d   : > { %v1232_v8 = vmul.f32 1.442695, %v1231_v6  ;;  %v904_v9 = vsel %vm657_vm2, %v3249_v7, 0.0 }
 0x41e   : > { %905 = vadd.xlane.f32.xlu0 %v904_v9  ;;  %v2808_v9 = vld [vmem:[%s3960_s8] ss:$0 sm:$0xff] }
 0x41f   : > { %3252 = vpow2.f32 %v1232_v8 }
 0x425   : > { %v3251_v11 = vpop.eup %3250 }
 0x426   : > { %v1069_v12 = vsel %vm657_vm2, %v3251_v11, 0.0 }
 0x427   : > { %1070 = vadd.xlane.f32.xlu1 %v1069_v12  ;;  %v2809_v12 = vld [vmem:[%s3961_s9] ss:$0 sm:$0xff] }
 0x429   : > { %v3253_v14 = vpop.eup %3252 }
 0x42a   : > { %v1234_v15 = vsel %vm657_vm2, %v3253_v14, 0.0 }
 0x42b   : > { %1235 = vadd.xlane.f32.xlu0 %v1234_v15 }
 0x438   : > { %1074 = vrot.lane.b32.xlu1 %v3550_v26, %s3976_s17  ;;  %s3983_s17 = smov 16  }
 0x43c   : > { %1239 = vrot.lane.b32.xlu1 %v3550_v26, %s3975_s29  ;;  %s3998_s29 = smov 112  }
 0x441   : > { %909 = vrot.lane.b32.xlu0 %v3550_v26, %s3974_s19  ;;  %s4002_s19 = smov 40  }
 0x4a7   : > { %v741_v16 = vpop.xlane.xlu1 %740 }
 0x4a8   : > { %3254 = vrcp.f32 %v741_v16  ;;  %v1535_v16 = vld [vmem:[%s3964_s12] sm:$0xff] }
 0x4ab   : > { %v906_v17 = vpop.xlane.xlu0 %905 }
 0x4ac   : > { %3256 = vrcp.f32 %v906_v17  ;;  %v1536_v17 = vld [vmem:[%s3964_s12 + $0x8] sm:$0xff] }
 0x4b2   : > { %v3255_v18 = vpop.eup %3254 }
 0x4b3   : > { %v743_v19 = vmul.f32 %v3255_v18, %v3247_v1  ;;  %v1447_v1 = vld [vmem:[%s3962_s10 + $0x8] sm:$0xff]  ;;  %v3147_v18 = vpack.c.bf16 %v1536_v17, %v1535_v16 }
 0x4b4   : > { %v1071_v20 = vpop.xlane.xlu1 %1070  ;;  %v3141_v2 = vpack.c.bf16 %v1447_v1, %v1446_v0  ;;  %v2821_v1 = vld [vmem:[%s3957_s5 + $0x1] ss:$0 sm:$0xff] }
 0x4b5   : > { %3258 = vrcp.f32 %v1071_v20  ;;  %2963 = vmatmul.mubr.msk.f32.vlgmr.msra.gmra.mrb[4].mxu1 %vm657_vm2, %v743_v19  ;;  %v1537_v19 = vld [vmem:[%s3964_s12 + $0x10] sm:$0xff]  ;;  %v1538_v20 = vld [vmem:[%s3964_s12 + $0x18] sm:$0xff] }
 0x4b6   : > { %2972 = vmatprep.mubr.msk.f32.mxu1 %vm3355_vm1, %v3356_v13  ;;  %v3257_v22 = vpop.eup %3256 }
 0x4b7   : > { %v908_v24 = vmul.f32 %v3257_v22, %v3249_v7  ;;  %v1539_v22 = vld [vmem:[%s3964_s12 + $0x20] sm:$0xff] }
 0x4b8   : > { %v1236_v21 = vpop.xlane.xlu0 %1235  ;;  %v1075_v25 = vpop.permute.xlu1 %1074 }
 0x4b9   : > { %3260 = vrcp.f32 %v1236_v21  ;;  %v3150_v21 = vpack.c.bf16 %v1538_v20, %v1537_v19 }
 0x4bc   : > { %v910_v27 = vpop.permute.xlu0 %909  ;;  %v1240_v29 = vpop.permute.xlu1 %1239 }
 0x4bd   : > { %2971 = vmatpush3.msra.mxu1 %v910_v27  ;;  %v1541_v27 = vld [vmem:[%s3964_s12 + $0x30] sm:$0xff] }
 0x4be   : > { %2973 = vmatmul.mubr.msk.f32.vlgmr.msra.gmra.mrb[6].mxu1 %vm657_vm2, %v908_v24  ;;  %2980 = vmatprep.subr.mxu1 %v3356_v13  ;;  %v1540_v24 = vld [vmem:[%s3964_s12 + $0x28] sm:$0xff] }
 0x4bf   : > { %v3259_v26 = vpop.eup %3258  ;;  %2981 = vmatpush3.msra.mxu1 %v1075_v25  ;;  %2982 = vmatprep.mubr.msk.f32.mxu1 %vm3355_vm1, %v3356_v13  ;;  %v3153_v25 = vpack.c.bf16 %v1540_v24, %v1539_v22 }
 0x4c0   : > { %v1073_v28 = vmul.f32 %v3259_v26, %v3251_v11  ;;  %2990 = vmatprep.subr.mxu1 %v3356_v13  ;;  %v1542_v26 = vld [vmem:[%s3964_s12 + $0x38] sm:$0xff] }
 0x4c2   : > { %2983 = vmatmul.mubr.msk.f32.vlgmr.msra.gmra.mrb[8].mxu1 %vm657_vm2, %v1073_v28  ;;  %v3156_v28 = vpack.c.bf16 %v1542_v26, %v1541_v27 }
 0x4c3   : > { %v3261_v30 = vpop.eup %3260  ;;  %2991 = vmatpush3.msra.mxu1 %v1240_v29  ;;  %2992 = vmatprep.mubr.msk.f32.mxu1 %vm3355_vm1, %v3356_v13  ;;  %v2810_v29 = vld [vmem:[%s3963_s11] ss:$0 sm:$0xff] }
 0x4c4   : > { %v1238_v31 = vmul.f32 %v3261_v30, %v3253_v14  ;;  %3140 = vmatprep.subr.bf16.mxu1 %v3354_v10 }
 0x4c6   : > { %2993 = vmatmul.mubr.msk.f32.vlgmr.msra.gmra.mrb[10].mxu1 %vm657_vm2, %v1238_v31 }
 0x4c7   : > { %3014 = vmatprep.mubr.msk.f32.mxu1 %vm3355_vm1, %v3356_v13  ;;  %3142 = vmatpush3.bf16.msra.mxu1 %v3141_v2 }
 0x4c8   : > { %3143 = vmatprep.subr.bf16.mxu1 %v3354_v10 }
 0x588   : > { %v816_v35 = vpop.f32.mrb[4].mxu1 }
 0x589   : > { %v2964_v36 = vpop.f32.mrb[5].mxu1 }
 0x591   : > { %v981_v41 = vpop.f32.mrb[6].mxu1 }
 0x592   : > { %1316 = vrot.lane.b32.xlu0 %v981_v41, %s3984_s18  ;;  %v2974_v42 = vpop.f32.mrb[7].mxu1  ;;  %s4003_s18 = smov 56  }
 0x595   : > { %v1146_v43 = vpop.f32.mrb[8].mxu1 }
 0x596   : > { %1320 = vrot.lane.b32.xlu1 %v1146_v43, %s3983_s17  ;;  %v2984_v44 = vpop.f32.mrb[9].mxu1  ;;  %s4006_s17 = smov 24  }
 0x599   : > { %v1311_v45 = vpop.f32.mrb[10].mxu1 }
 0x59a   : > { %1324 = vrot.lane.b32.xlu0 %v1311_v45, %s3982_s27  ;;  %v2994_v46 = vpop.f32.mrb[11].mxu1  ;;  %s3999_s27 = smov 104  }
 0x604   : > { %v1317_v47 = vpop.permute.xlu0 %1316 }
 0x605   : > { %v1327_v49 = vsel %vm657_vm2, %v816_v35, %v1317_v47 }
 0x608   : > { %v1321_v48 = vpop.permute.xlu1 %1320 }
 0x609   : > { %v1329_v50 = vsel %vm1328_vm3, %v1327_v49, %v1321_v48 }
 0x60c   : > { %v1325_v51 = vpop.permute.xlu0 %1324 }
 0x60d   : > { %v1331_v52 = vsel %vm1330_vm4, %v1329_v50, %v1325_v51  ;;  %v2816_v50 = vld [vmem:[%s3956_s4 + $0x20] sm:$0xff]  ;;  %v2817_v51 = vld [vmem:[%s3956_s4 + $0x28] sm:$0xff] }
 0x60e   : > { %3004 = vmatmul.mubr.msk.f32.vlgmr.msra.gmra.mrb[6].mxu0 %vm534_vm0, %v1331_v52  ;;  %v3159_v52 = vpack.c.bf16 %v2817_v51, %v2816_v50 }
 0x60f   : > { %3033 = vmatprep.mubr.msk.f32.mxu0 %vm3355_vm1, %v3356_v13  ;;  %3148 = vmatpush3.bf16.msra.mxu0 %v3147_v18 }
 0x610   : > { %3149 = vmatprep.subr.bf16.mxu0 %v3354_v10 }
 0x613   : > { %3151 = vmatpush3.bf16.msra.mxu0 %v3150_v21 }
 0x614   : > { %3152 = vmatprep.subr.bf16.mxu0 %v3354_v10 }
 0x617   : > { %3154 = vmatpush3.bf16.msra.mxu0 %v3153_v25 }
 0x618   : > { %3155 = vmatprep.subr.bf16.mxu0 %v3354_v10 }
 0x61b   : > { %3157 = vmatpush3.bf16.msra.mxu0 %v3156_v28 }
 0x61c   : > { %3057 = vmatprep.subr.mxu0 %v3356_v13 }
 0x6e1   : > { %v1412_v54 = vpop.f32.mrb[6].mxu0 }
 0x6e2   : > { %v1413_v55 = vadd.f32 %v2806_v53, %v1412_v54  ;;  %v3005_v56 = vpop.f32.mrb[7].mxu0  ;;  %v2818_v53 = vld [vmem:[%s3956_s4 + $0x30] sm:$0xff]  ;;  %v2819_v54 = vld [vmem:[%s3956_s4 + $0x38] sm:$0xff] }
 0x6e4   : > { %v1416_v57 = vadd.f32 %v1413_v55, %v3541_v23  ;;  %v1448_v23 = vld [vmem:[%s3962_s10 + $0x10] sm:$0xff]  ;;  %v3162_v55 = vpack.c.bf16 %v2819_v54, %v2818_v53 }
 0x6e5   : > { %v3144_v4 = vpack.c.bf16 %v1449_v3, %v1448_v23 }
 0x6e6   : > { %v1419_v58 = vsel %vm534_vm0, %v1416_v57, 0.0 }
 0x6e7   : > { %1420 = vadd.xlane.f32.xlu1 %v1419_v58  ;;  %3145 = vmatpush3.bf16.msra.mxu1 %v3144_v4 }
 0x6e8   : > { %3158 = vmatprep.subr.bf16.mxu1 %v3354_v10 }
 0x774   : > { %v1421_v59 = vpop.xlane.xlu1 %1420 }
 0x775   : > { %v1422_v60 = vmul.f32 0.03125, %v1421_v59 }
 0x777   : > { %v1423_v61 = vsub.f32 %v1416_v57, %v1422_v60  ;;  %v2814_v60 = vld [vmem:[%s3966_s14] ss:$0 sm:$0xff] }
 0x779   : > { %v1424_v62 = vmul.f32 %v1423_v61, %v1423_v61 }
 0x77b   : > { %v1425_v63 = vsel %vm534_vm0, %v1424_v62, 0.0  ;;  %v2815_v62 = vld [vmem:[%s3967_s15] ss:$0 sm:$0xff] }
 0x77c   : > { %1426 = vadd.xlane.f32.xlu0 %v1425_v63 }
 0x809   : > { %v1427_v5 = vpop.xlane.xlu0 %1426 }
 0x80a   : > { %v1428_v6 = vmul.f32 0.03125, %v1427_v5 }
 0x80c   : > { %v1429_v7 = vadd.f32 1e-12, %v1428_v6 }
 0x80e   : > { %3262 = vrsqrt.f32 %v1429_v7 }
 0x818   : > { %v3263_v8 = vpop.eup %3262 }
 0x819   : > { %v1431_v11 = vmul.f32 %v3263_v8, %v1423_v61 }
 0x81b   : > { %v1438_v14 = vmul.f32 %v2808_v9, %v1431_v11 }
 0x81d   : > { %v1445_v15 = vadd.f32 %v2809_v12, %v1438_v14 }
 0x81f   : > { %3015 = vmatmul.mubr.msk.f32.vlgmr.msra.gmra.mrb[12].mxu1 %vm534_vm0, %v1445_v15 }
 0x820   : > { %3044 = vmatprep.mubr.msk.f32.mxu1 %vm3355_vm1, %v3356_v13  ;;  %3160 = vmatpush3.bf16.msra.mxu1 %v3159_v52 }
 0x821   : > { %3161 = vmatprep.subr.bf16.mxu1 %v3354_v10 }
 0x824   : > { %3163 = vmatpush3.bf16.msra.mxu1 %v3162_v55 }
 0x825   : > { %3047 = vmatprep.subr.mxu1 %v3356_v13 }
 0x8f2   : > { %v1526_v30 = vpop.f32.mrb[12].mxu1 }
 0x8f3   : > { %v1527_v31 = vadd.f32 %v2810_v29, %v1526_v30  ;;  %v3016_v32 = vpop.f32.mrb[13].mxu1 }
 0x8f5   : > { %v1531_v33 = vmul.f32 0.70710677, %v1527_v31  ;;  %v1530_v35 = vmul.f32 0.5, %v1527_v31 }
 0x8f7   : > { %3264 = verf.f32 %v1531_v33 }
 0x901   : > { %v3265_v34 = vpop.eup %3264 }
 0x902   : > { %v1533_v36 = vadd.f32 1.0, %v3265_v34 }
 0x904   : > { %v1534_v37 = vmul.f32 %v1533_v36, %v1530_v35 }
 0x906   : > { %3034 = vmatmul.mubr.msk.f32.vlgmr.msra.gmra.mrb[8].mxu0 %vm1550_vm5, %v1534_v37 }
 0x907   : > { %3059 = vmatprep.mubr.msk.f32.mxu0 %vm3355_vm1, %v3356_v13 }
 0x9d9   : > { %v1620_v40 = vpop.f32.mrb[8].mxu0 }
 0x9da   : > { %v1621_v41 = vadd.f32 %v2812_v38, %v1620_v40  ;;  %v3035_v42 = vpop.f32.mrb[9].mxu0 }
 0x9dc   : > { %v1624_v43 = vadd.f32 %v1621_v41, %v1445_v15 }
 0x9de   : > { %v1627_v44 = vsel %vm534_vm0, %v1624_v43, 0.0 }
 0x9df   : > { %1628 = vadd.xlane.f32.xlu0 %v1627_v44 }
 0xa6c   : > { %v1629_v45 = vpop.xlane.xlu0 %1628 }
 0xa6d   : > { %v1630_v46 = vmul.f32 0.03125, %v1629_v45 }
 0xa6f   : > { %v1631_v47 = vsub.f32 %v1624_v43, %v1630_v46 }
 0xa71   : > { %v1632_v48 = vmul.f32 %v1631_v47, %v1631_v47 }
 0xa73   : > { %v1633_v49 = vsel %vm534_vm0, %v1632_v48, 0.0 }
 0xa74   : > { %1634 = vadd.xlane.f32.xlu1 %v1633_v49 }
 0xb01   : > { %v1635_v56 = vpop.xlane.xlu1 %1634 }
 0xb02   : > { %v1636_v57 = vmul.f32 0.03125, %v1635_v56 }
 0xb04   : > { %v1637_v58 = vadd.f32 1e-12, %v1636_v57 }
 0xb06   : > { %3266 = vrsqrt.f32 %v1637_v58 }
 0xb10   : > { %v3267_v59 = vpop.eup %3266 }
 0xb11   : > { %v1639_v61 = vmul.f32 %v3267_v59, %v1631_v47 }
 0xb13   : > { %v1646_v63 = vmul.f32 %v2814_v60, %v1639_v61 }
 0xb15   : > { %v3734_v0 = vadd.f32 %v2815_v62, %v1646_v63 }
 0xb17   : > { %3045 = vmatmul.mubr.msk.f32.vlgmr.msra.gmra.mrb[14].mxu1 %vm534_vm0, %v3734_v0 }
 0xb18   : > { %3049 = vmatprep.mubr.msk.f32.mxu1 %vm3355_vm1, %v3356_v13 }
 0xbea   : > { %v1736_v2 = vpop.f32.mrb[14].mxu1 }
 0xbeb   : > { %v3743_v23 = vadd.f32 %v2821_v1, %v1736_v2  ;;  %v3046_v3 = vpop.f32.mrb[15].mxu1 }
 0xbec   : > { %v2835_v3 = vld [vmem:[%s3958_s6 + $0x20] sm:$0xff] }
 0xbed   : > { %1909 = vrot.lane.b32.xlu1 %v3743_v23, %s3359_s28  ;;  %1742 = vrot.lane.b32.xlu0 %v3743_v23, %s3357_s20  ;;  %v1740_v4 = vmul.f32 0.35355338, %v3743_v23  ;;  %s4000_s20 = smov 64   ;;  %s4001_s28 = smov 48  }
 0xbf1   : > { %2074 = vrot.lane.b32.xlu0 %v3743_v23, %s3995_s26  ;;  %1907 = vrot.lane.b32.xlu1 %v1740_v4, %s3996_s23 }
 0xbf5   : > { %2239 = vrot.lane.b32.xlu0 %v3743_v23, %s3997_s30  ;;  %2072 = vrot.lane.b32.xlu1 %v1740_v4, %s3998_s29 }
 0xbf9   : > { %2237 = vrot.lane.b32.xlu1 %v1740_v4, %s3999_s27  ;;  %s521_s27 = sand.u32 1, %s3344_s22  }
 0xbfa   : > { %s522_s26 = scalar_lea.vmem [#allocation2], %s521_s27 }
 0xbfb   : > { %s2721_s23 = sshll.u32 %s522_s26, 4  ;;  %s3911_s23 = int_to_ptr.vmem [resolvable:$true] %s2721_s23 }
 0xc5f   : > { %v1910_v5 = vpop.permute.xlu1 %1909  ;;  %v1743_v6 = vpop.permute.xlu0 %1742 }
 0xc60   : > { %3048 = vmatpush3.xpose.msk.msra.mxu1 %vm657_vm2, %v1743_v6  ;;  %3058 = vmatpush3.xpose.msk.msra.mxu0 %vm657_vm2, %v1910_v5  ;;  %v2837_v6 = vld [vmem:[%s3958_s6 + $0x30] sm:$0xff] }
 0xc61   : > { %3067 = vmatprep.subr.mxu0 %v3356_v13  ;;  %3052 = vmatprep.subr.mxu1 %v3356_v13 }
 0xc63   : > { %v2075_v7 = vpop.permute.xlu0 %2074  ;;  %v1908_v8 = vpop.permute.xlu1 %1907  ;;  %3050 = vmatmul.mubr.msk.f32.vlgmr.msra.gmra.mrb[16].mxu1 %vm657_vm2, %v1740_v4  ;;  %v2836_v4 = vld [vmem:[%s3958_s6 + $0x28] sm:$0xff] }
 0xc64   : > { %3060 = vmatmul.mubr.msk.f32.vlgmr.msra.gmra.mrb[10].mxu0 %vm657_vm2, %v1908_v8  ;;  %3054 = vmatprep.mubr.msk.f32.mxu1 %vm3355_vm1, %v3356_v13  ;;  %v3165_v5 = vpack.c.bf16 %v2836_v4, %v2835_v3 }
 0xc65   : > { %3068 = vmatpush3.xpose.msk.msra.mxu0 %vm657_vm2, %v2075_v7  ;;  %3069 = vmatprep.mubr.msk.f32.mxu0 %vm3355_vm1, %v3356_v13  ;;  %v2838_v7 = vld [vmem:[%s3958_s6 + $0x38] sm:$0xff] }
 0xc66   : > { %3077 = vmatprep.subr.mxu0 %v3356_v13  ;;  %v3168_v8 = vpack.c.bf16 %v2838_v7, %v2837_v6  ;;  %v2857_v6 = vld [vmem:[%s3965_s13 + $0x1] sm:$0x1] }
 0xc67   : > { %v2240_v9 = vpop.permute.xlu0 %2239  ;;  %v2073_v11 = vpop.permute.xlu1 %2072 }
 0xc68   : > { %3070 = vmatmul.mubr.msk.f32.vlgmr.msra.gmra.mrb[12].mxu0 %vm657_vm2, %v2073_v11 }
 0xc69   : > { %3078 = vmatpush3.xpose.msk.msra.mxu0 %vm657_vm2, %v2240_v9  ;;  %3079 = vmatprep.mubr.msk.f32.mxu0 %vm3355_vm1, %v3356_v13 }
 0xc6a   : > { %3164 = vmatprep.subr.bf16.mxu0 %v3354_v10 }
 0xc6b   : > { %v2238_v12 = vpop.permute.xlu1 %2237 }
 0xc6c   : > { %3080 = vmatmul.mubr.msk.f32.vlgmr.msra.gmra.mrb[14].mxu0 %vm657_vm2, %v2238_v12 }
 0xc6d   : > { %3095 = vmatprep.mubr.msk.f32.mxu0 %vm3355_vm1, %v3356_v13  ;;  %3166 = vmatpush3.bf16.msra.mxu0 %v3165_v5 }
 0xc6e   : > { %3167 = vmatprep.subr.bf16.mxu0 %v3354_v10 }
 0xc71   : > { %3169 = vmatpush3.bf16.msra.mxu0 %v3168_v8 }
 0xc72   : > { %3176 = vmatprep.subr.bf16.mxu0 %v3354_v10 }
 0xd36   : > { %v1815_v14 = vpop.f32.mrb[16].mxu1 }
 0xd37   : > { %v1816_v15 = vadd.f32 %v1815_v14, %v3588_v39  ;;  %v3051_v16 = vpop.f32.mrb[17].mxu1  ;;  %v1981_v17 = vpop.f32.mrb[10].mxu0 }
 0xd38   : > { %v1982_v18 = vadd.f32 %v1981_v17, %v3588_v39  ;;  %v3061_v19 = vpop.f32.mrb[11].mxu0 }
 0xd39   : > { %v1820_v20 = vsel %vm1819_vm6, %v1816_v15, -inf }
 0xd3a   : > { %1821 = vmax.xlane.f32.xlu0 %v1820_v20  ;;  %v1985_v21 = vsel %vm1819_vm6, %v1982_v18, -inf }
 0xd3b   : > { %1986 = vmax.xlane.f32.xlu1 %v1985_v21  ;;  %v2146_v22 = vpop.f32.mrb[12].mxu0 }
 0xd3c   : > { %v2147_v24 = vadd.f32 %v2146_v22, %v3588_v39  ;;  %v3071_v25 = vpop.f32.mrb[13].mxu0 }
 0xd3e   : > { %v2150_v27 = vsel %vm1819_vm6, %v2147_v24, -inf }
 0xd3f   : > { %v2311_v26 = vpop.f32.mrb[14].mxu0  ;;  %2151 = vmax.xlane.f32.xlu0 %v2150_v27  ;;  %v2839_v27 = vld [vmem:[%s3959_s7 + $0x1] sm:$0x1] }
 0xd40   : > { %v2312_v28 = vadd.f32 %v2311_v26, %v3588_v39  ;;  %v3081_v29 = vpop.f32.mrb[15].mxu0 }
 0xd42   : > { %v2315_v30 = vsel %vm1819_vm6, %v2312_v28, -inf }
 0xd43   : > { %2316 = vmax.xlane.f32.xlu0 %v2315_v30 }
 0xd4c   : > { %1831 = vrot.lane.b32.xlu1 %v3743_v23, %s4000_s20  ;;  %s2709_s20 = scalar_lea.sflag [#allocation3], %s521_s27 }
 0xdc7   : > { %v1822_v31 = vpop.xlane.xlu0 %1821 }
 0xdc8   : > { %v1823_v32 = vsub.f32 %v1816_v15, %v1822_v31  ;;  %v1987_v33 = vpop.xlane.xlu1 %1986 }
 0xdc9   : > { %v1988_v34 = vsub.f32 %v1982_v18, %v1987_v33 }
 0xdca   : > { %v1824_v35 = vmul.f32 1.442695, %v1823_v32 }
 0xdcb   : > { %v1989_v36 = vmul.f32 1.442695, %v1988_v34 }
 0xdcc   : > { %3268 = vpow2.f32 %v1824_v35  ;;  %v1832_v37 = vpop.permute.xlu1 %1831  ;;  %v2152_v38 = vpop.xlane.xlu0 %2151 }
 0xdcd   : > { %3270 = vpow2.f32 %v1989_v36  ;;  %v2153_v40 = vsub.f32 %v2147_v24, %v2152_v38  ;;  %3053 = vmatpush3.msra.mxu1 %v1832_v37  ;;  %v2844_v37 = vld [vmem:[%s3962_s10 + $0x28] sm:$0xff] }
 0xdce   : > { %3062 = vmatprep.subr.mxu1 %v3356_v13 }
 0xdcf   : > { %v2154_v39 = vmul.f32 1.442695, %v2153_v40  ;;  %v2846_v40 = vld [vmem:[%s3962_s10 + $0x38] sm:$0xff] }
 0xdd0   : > { %v2317_v41 = vpop.xlane.xlu0 %2316 }
 0xdd1   : > { %3272 = vpow2.f32 %v2154_v39  ;;  %v2318_v42 = vsub.f32 %v2312_v28, %v2317_v41 }
 0xdd3   : > { %v2319_v43 = vmul.f32 1.442695, %v2318_v42 }
 0xdd5   : > { %3274 = vpow2.f32 %v2319_v43 }
 0xdd6   : > { %v3269_v44 = vpop.eup %3268 }
 0xdd7   : > { %v3271_v45 = vpop.eup %3270  ;;  %v1826_v46 = vsel %vm1819_vm6, %v3269_v44, 0.0 }
 0xdd8   : > { %1827 = vadd.xlane.f32.xlu1 %v1826_v46  ;;  %v1991_v47 = vsel %vm1819_vm6, %v3271_v45, 0.0 }
 0xdd9   : > { %1992 = vadd.xlane.f32.xlu0 %v1991_v47  ;;  %v2842_v47 = vld [vmem:[%s3961_s9 + $0x1] sm:$0x1] }
 0xddb   : > { %v3273_v48 = vpop.eup %3272 }
 0xddc   : > { %v2156_v49 = vsel %vm1819_vm6, %v3273_v48, 0.0 }
 0xddd   : > { %2157 = vadd.xlane.f32.xlu1 %v2156_v49 }
 0xddf   : > { %v3275_v50 = vpop.eup %3274 }
 0xde0   : > { %v2321_v51 = vsel %vm1819_vm6, %v3275_v50, 0.0 }
 0xde1   : > { %2322 = vadd.xlane.f32.xlu0 %v2321_v51  ;;  %v2850_v51 = vld [vmem:[%s3964_s12 + $0x48] sm:$0xff] }
 0xdee   : > { %2161 = vrot.lane.b32.xlu1 %v3743_v23, %s4001_s28  ;;  %s3290_s28 = scalar_lea.vmem %s3911_s23, 16 }
 0xdef   : > { %p3291_p11 = scmp.ne.s32.totalorder %s3911_s23, %s3290_s28 }
 0xdf1   : > { %p3292_p12 = pnand %p3291_p11, %p3495_p5 }
 0xdf2   : > { %2326 = vrot.lane.b32.xlu1 %v3743_v23, %s4002_s19  ;;  %s4004_s19 = smov 8  }
 0xdf3   : > { %p3293_p13 = pneg %p3292_p12 }
 0xdf7   : > { %1996 = vrot.lane.b32.xlu0 %v3743_v23, %s4003_s18  ;;  %s4005_s18 = smov 16  }
 0xe65   : > { %v1828_v52 = vpop.xlane.xlu1 %1827 }
 0xe66   : > { %3276 = vrcp.f32 %v1828_v52  ;;  %v1993_v53 = vpop.xlane.xlu0 %1992 }
 0xe67   : > { %3278 = vrcp.f32 %v1993_v53  ;;  %v2851_v53 = vld [vmem:[%s3964_s12 + $0x50] sm:$0xff] }
 0xe6a   : > { %v2158_v54 = vpop.xlane.xlu1 %2157 }
 0xe6b   : > { %3280 = vrcp.f32 %v2158_v54  ;;  %v2852_v54 = vld [vmem:[%s3964_s12 + $0x58] sm:$0xff] }
 0xe6e   : > { %v2323_v55 = vpop.xlane.xlu0 %2322  ;;  %v2162_v61 = vpop.permute.xlu1 %2161 }
 0xe6f   : > { %3282 = vrcp.f32 %v2323_v55  ;;  %v3180_v55 = vpack.c.bf16 %v2852_v54, %v2851_v53 }
 0xe70   : > { %v3277_v56 = vpop.eup %3276 }
 0xe71   : > { %v1830_v57 = vmul.f32 %v3277_v56, %v3269_v44  ;;  %v3279_v58 = vpop.eup %3278  ;;  %v2853_v56 = vld [vmem:[%s3964_s12 + $0x60] sm:$0xff] }
 0xe72   : > { %v1997_v59 = vpop.permute.xlu0 %1996  ;;  %v1995_v60 = vmul.f32 %v3279_v58, %v3271_v45  ;;  %v2327_v2 = vpop.permute.xlu1 %2326  ;;  %v2841_v45 = vld [vmem:[%s3960_s8 + $0x1] sm:$0x1] }
 0xe73   : > { %3055 = vmatmul.mubr.msk.f32.vlgmr.msra.gmra.mrb[18].mxu1 %vm657_vm2, %v1830_v57  ;;  %v2854_v57 = vld [vmem:[%s3964_s12 + $0x68] sm:$0xff] }
 0xe74   : > { %3063 = vmatpush3.msra.mxu1 %v1997_v59  ;;  %3064 = vmatprep.mubr.msk.f32.mxu1 %vm3355_vm1, %v3356_v13  ;;  %v3183_v58 = vpack.c.bf16 %v2854_v57, %v2853_v56  ;;  %v2855_v59 = vld [vmem:[%s3964_s12 + $0x70] sm:$0xff] }
 0xe75   : > { %3072 = vmatprep.subr.mxu1 %v3356_v13  ;;  %v3281_v62 = vpop.eup %3280 }
 0xe76   : > { %v2160_v63 = vmul.f32 %v3281_v62, %v3273_v48  ;;  %v2847_v62 = vld [vmem:[%s3963_s11 + $0x1] sm:$0x1] }
 0xe77   : > { %3065 = vmatmul.mubr.msk.f32.vlgmr.msra.gmra.mrb[20].mxu1 %vm657_vm2, %v1995_v60  ;;  %v2856_v60 = vld [vmem:[%s3964_s12 + $0x78] sm:$0xff] }
 0xe78   : > { %3073 = vmatpush3.msra.mxu1 %v2162_v61  ;;  %3074 = vmatprep.mubr.msk.f32.mxu1 %vm3355_vm1, %v3356_v13  ;;  %v3186_v61 = vpack.c.bf16 %v2856_v60, %v2855_v59 }
 0xe79   : > { %3082 = vmatprep.subr.mxu1 %v3356_v13  ;;  %v3283_v1 = vpop.eup %3282 }
 0xe7a   : > { %v2325_v23 = vmul.f32 %v3283_v1, %v3275_v50  ;;  %v2849_v50 = vld [vmem:[%s3964_s12 + $0x40] sm:$0xff] }
 0xe7b   : > { %3075 = vmatmul.mubr.msk.f32.vlgmr.msra.gmra.mrb[22].mxu1 %vm657_vm2, %v2160_v63  ;;  %v3177_v52 = vpack.c.bf16 %v2850_v51, %v2849_v50 }
 0xe7c   : > { %3083 = vmatpush3.msra.mxu1 %v2327_v2  ;;  %3084 = vmatprep.mubr.msk.f32.mxu1 %vm3355_vm1, %v3356_v13 }
 0xe7d   : > { %3170 = vmatprep.subr.bf16.mxu1 %v3354_v10 }
 0xe7f   : > { %3085 = vmatmul.mubr.msk.f32.vlgmr.msra.gmra.mrb[24].mxu1 %vm657_vm2, %v2325_v23 }
 0xe80   : > { %3106 = vmatprep.mubr.msk.f32.mxu1 %vm3355_vm1, %v3356_v13 }
 0xf46   : > { %v1903_v9 = vpop.f32.mrb[18].mxu1 }
 0xf47   : > { %v3056_v11 = vpop.f32.mrb[19].mxu1 }
 0xf4a   : > { %v2068_v12 = vpop.f32.mrb[20].mxu1 }
 0xf4b   : > { %2403 = vrot.lane.b32.xlu0 %v2068_v12, %s4004_s19  ;;  %v3066_v14 = vpop.f32.mrb[21].mxu1 }
 0xf4e   : > { %v2233_v15 = vpop.f32.mrb[22].mxu1 }
 0xf4f   : > { %2407 = vrot.lane.b32.xlu1 %v2233_v15, %s4005_s18  ;;  %v3076_v16 = vpop.f32.mrb[23].mxu1 }
 0xf52   : > { %v2398_v17 = vpop.f32.mrb[24].mxu1 }
 0xf53   : > { %2411 = vrot.lane.b32.xlu0 %v2398_v17, %s4006_s17  ;;  %v3086_v18 = vpop.f32.mrb[25].mxu1  ;;  %s2861_s17 = sshll.u32 %s3478_s25, 4  ;;  %s3371_s25 = smov [#allocation2]  }
 0xf54   : > { %s3909_s1 = scalar_lea.hbm %s3968_s16, %s2861_s17  ;;  %s3294_s19 = sshll.u32 %s3371_s25, 4  ;;  %s3295_s19 = int_to_ptr.vmem [resolvable:$false] %s3294_s19 }
 0xf55   : > { %s3296_s18 = scalar_lea.vmem %s3295_s19, 32  ;;  %p3297_p0 = scmp.lt.s32.totalorder %s3911_s23, %s3295_s19 }
 0xf56   : > { %p3298_p1 = scmp.lt.s32.totalorder %s3296_s18, %s3290_s28 }
 0xf58   : > { %p3299_p2 = por %p3298_p1, %p3297_p0 }
 0xf5a   : > { %p3300_p3 = pnand %p3299_p2, %p3293_p13 }
 0xfbd   : > { %v2404_v19 = vpop.permute.xlu0 %2403 }
 0xfbe   : > { %v2414_v21 = vsel %vm657_vm2, %v1903_v9, %v2404_v19 }
 0xfc1   : > { %v2408_v20 = vpop.permute.xlu1 %2407 }
 0xfc2   : > { %v2415_v22 = vsel %vm1328_vm3, %v2414_v21, %v2408_v20 }
 0xfc5   : > { %v2412_v24 = vpop.permute.xlu0 %2411 }
 0xfc6   : > { %v2416_v25 = vsel %vm1330_vm4, %v2415_v22, %v2412_v24  ;;  %v2859_v24 = vld [vmem:[%s3966_s14 + $0x1] sm:$0x1] }
 0xfc7   : > { %3096 = vmatmul.mubr.msk.f32.vlgmr.msra.gmra.mrb[16].mxu0 %vm534_vm0, %v2416_v25 }
 0xfc8   : > { %3125 = vmatprep.mubr.msk.f32.mxu0 %vm3355_vm1, %v3356_v13  ;;  %v2843_v13 = vld [vmem:[%s3962_s10 + $0x20] sm:$0xff]  ;;  %3178 = vmatpush3.bf16.msra.mxu0 %v3177_v52 }
 0xfc9   : > { %v3171_v38 = vpack.c.bf16 %v2844_v37, %v2843_v13  ;;  %3179 = vmatprep.subr.bf16.mxu0 %v3354_v10 }
 0xfcb   : > { %3172 = vmatpush3.bf16.msra.mxu1 %v3171_v38 }
 0xfcc   : > { %3173 = vmatprep.subr.bf16.mxu1 %v3354_v10  ;;  %3181 = vmatpush3.bf16.msra.mxu0 %v3180_v55 }
 0xfcd   : > { %3182 = vmatprep.subr.bf16.mxu0 %v3354_v10 }
 0xfd0   : > { %3184 = vmatpush3.bf16.msra.mxu0 %v3183_v58 }
 0xfd1   : > { %3185 = vmatprep.subr.bf16.mxu0 %v3354_v10 }
 0xfd4   : > { %3187 = vmatpush3.bf16.msra.mxu0 %v3186_v61 }
0x109a   : > { %v2493_v26 = vpop.f32.mrb[16].mxu0 }
0x109b   : > { %v2494_v28 = vadd.f32 %v2839_v27, %v2493_v26  ;;  %v3097_v29 = vpop.f32.mrb[17].mxu0  ;;  %v2860_v27 = vld [vmem:[%s3967_s15 + $0x1] sm:$0x1] }
0x109d   : > { %v2497_v30 = vadd.f32 %v2494_v28, %v3734_v0  ;;  %v2845_v0 = vld [vmem:[%s3962_s10 + $0x30] sm:$0xff] }
0x109e   : > { %v3174_v39 = vpack.c.bf16 %v2846_v40, %v2845_v0 }
0x109f   : > { %v2503_v31 = vsel %vm2502_vm7, %v2497_v30, 0.0 }
0x10a0   : > { %2504 = vadd.xlane.f32.xlu1 %v2503_v31  ;;  %3175 = vmatpush3.bf16.msra.mxu1 %v3174_v39 }
0x112d   : > { %v2505_v32 = vpop.xlane.xlu1 %2504 }
0x112e   : > { %v2506_v33 = vmul.f32 0.03125, %v2505_v32 }
0x1130   : > { %v2507_v34 = vsub.f32 %v2497_v30, %v2506_v33 }
0x1132   : > { %v2508_v35 = vmul.f32 %v2507_v34, %v2507_v34 }
0x1134   : > { %v2509_v36 = vsel %vm2502_vm7, %v2508_v35, 0.0 }
0x1135   : > { %2510 = vadd.xlane.f32.xlu0 %v2509_v36 }
0x11c2   : > { %v2511_v41 = vpop.xlane.xlu0 %2510 }
0x11c3   : > { %v2512_v42 = vmul.f32 0.03125, %v2511_v41 }
0x11c5   : > { %v2513_v43 = vadd.f32 1e-12, %v2512_v42 }
0x11c7   : > { %3284 = vrsqrt.f32 %v2513_v43 }
0x11d1   : > { %v3285_v44 = vpop.eup %3284 }
0x11d2   : > { %v2515_v46 = vmul.f32 %v3285_v44, %v2507_v34 }
0x11d4   : > { %v2516_v48 = vmul.f32 %v2841_v45, %v2515_v46 }
0x11d6   : > { %v2517_v49 = vadd.f32 %v2842_v47, %v2516_v48 }
0x11d8   : > { %3107 = vmatmul.mubr.msk.f32.vlgmr.msra.gmra.mrb[26].mxu1 %vm534_vm0, %v2517_v49 }
0x12ab   : > { %v2594_v63 = vpop.f32.mrb[26].mxu1 }
0x12ac   : > { %v2595_v1 = vadd.f32 %v2847_v62, %v2594_v63  ;;  %v3108_v2 = vpop.f32.mrb[27].mxu1 }
0x12ae   : > { %v2599_v23 = vmul.f32 0.70710677, %v2595_v1  ;;  %v2598_v3 = vmul.f32 0.5, %v2595_v1 }
0x12b0   : > { %3286 = verf.f32 %v2599_v23 }
0x12ba   : > { %v3287_v10 = vpop.eup %3286 }
0x12bb   : > { %v2601_v4 = vadd.f32 1.0, %v3287_v10 }
0x12bd   : > { %v2602_v5 = vmul.f32 %v2601_v4, %v2598_v3 }
0x12bf   : > { %3126 = vmatmul.mubr.msk.f32.vlgmr.msra.gmra.mrb[18].mxu0 %vm1550_vm5, %v2602_v5 }
0x1392   : > { %v2683_v7 = vpop.f32.mrb[18].mxu0 }
0x1393   : > { %v2684_v8 = vadd.f32 %v2857_v6, %v2683_v7  ;;  %v3127_v9 = vpop.f32.mrb[19].mxu0 }
0x1395   : > { %v2687_v11 = vadd.f32 %v2684_v8, %v2517_v49 }
0x1397   : > { %v2692_v12 = vsel %vm2502_vm7, %v2687_v11, 0.0 }
0x1398   : > { %2693 = vadd.xlane.f32.xlu0 %v2692_v12 }
0x1425   : > { %v2694_v14 = vpop.xlane.xlu0 %2693 }
0x1426   : > { %v2695_v15 = vmul.f32 0.03125, %v2694_v14 }
0x1428   : > { %v2696_v16 = vsub.f32 %v2687_v11, %v2695_v15 }
0x142a   : > { %v2697_v17 = vmul.f32 %v2696_v16, %v2696_v16 }
0x142c   : > { %v2698_v18 = vsel %vm2502_vm7, %v2697_v17, 0.0 }
0x142d   : > { %2699 = vadd.xlane.f32.xlu1 %v2698_v18 }
0x14ba   : > { %v2700_v19 = vpop.xlane.xlu1 %2699 }
0x14bb   : > { %v2701_v20 = vmul.f32 0.03125, %v2700_v19 }
0x14bd   : > { %v2702_v21 = vadd.f32 1e-12, %v2701_v20 }
0x14bf   : > { %3288 = vrsqrt.f32 %v2702_v21 }
0x14c9   : > { %v3289_v22 = vpop.eup %3288 }
0x14ca   : > { %v2704_v25 = vmul.f32 %v3289_v22, %v2696_v16 }
0x14cc   : > { %v2705_v26 = vmul.f32 %v2859_v24, %v2704_v25 }
0x14ce   : > { %v2706_v28 = vadd.f32 %v2860_v27, %v2705_v26 }
0x14d0   : > { %2707 = vst.msk [vmem:[%s522_s26] sm:$0x1] %vm2502_vm7, %v2706_v28 }
0x14d1   : > { %3303 = shalt.err (!%p3300_p3)
}
0x14d2   : > { %s3304_s27 = scalar_lea.hbm %s3909_s1, 16  ;;  %s3308_s30 = scalar_lea.hbm %s3968_s16, 32 }
0x14d3   : > { %p3305_p4 = scmp.ne.s32.totalorder %s3909_s1, %s3304_s27  ;;  %p3309_p9 = scmp.lt.u32.totalorder %s3909_s1, %s3968_s16 }
0x14d4   : > { %p3310_p10 = scmp.lt.u32.totalorder %s3308_s30, %s3304_s27  ;;  %p3312_p12 = scmp.lt.u32.totalorder %s3304_s27, %s3909_s1 }
0x14d5   : > { %p3306_p7 = pnand %p3305_p4, %p3495_p5 }
0x14d6   : > { %p3311_p11 = por %p3310_p10, %p3309_p9 }
0x14d7   : > { %p3307_p8 = pneg %p3306_p7 }
0x14d8   : > { %p3313_p13 = por %p3312_p12, %p3311_p11 }
0x14da   : > { %p3314_p0 = pnand %p3313_p13, %p3307_p8 }
0x14dc   : > { %3317 = shalt.err (!%p3314_p0)
}
0x14dd   : > { %3188 = dma.vmem_to_hbm [thread:$0]  (%p3495_p5), %s3911_s23, 16, %s3909_s1, %s2709_s20  }
0x14de PF: > { %p3194_p1 = scmp.ge.s32.totalorder %s3352_s24, 2  ;;  %s2733_s19 = sand.u32 1, %s3340_s21  }
0x14df   : > { %s2734_s18 = scalar_lea.sflag [#allocation3], %s2733_s19 }
0x14e0   : > { %p3191_p2 = pnand %p3194_p1, %p3499_p6 }
0x14e2   : > { %3335 = dma.done.wait (!%p3191_p2), %s2734_s18, 16  }
0x14e3   : > { %3337 = vsyncadd (!%p3191_p2), %s2734_s18, 4294967280  ;;  %s4008_s24 = sld [smem:[#allocation6_spill]]  ;;  %s4009_s27 = sld [smem:[#allocation5_spill]] }
0x14e4   : > { %s4010_s23 = sld [smem:[#allocation7_spill]]  ;;  %s4011_s21 = smov %s3344_s22 }
0x14e9   : > { %p26_p3 = scmp.ge.s32.totalorder %s4008_s24, 4   ;;  %s4012_s22 = smov %s4009_s27 }
0x14eb   :  { %28 = sbr.rel (!%p26_p3) target bundleno = 6 (0x6), region = 134 }
0x14f2   :  { %2738 = vsyncpa [#allocation3], 1 }
0x14f3   :  { %2740 = vsyncpa [#allocation3 + $0x1], 1 }

</bundles_post_ra>
